<compile_context>
chip_gen: v6e
topology: v6e:2x2x1
jax: 0.10.0
libtpu: 0.0.40
codegen_flags: <defaults>
</compile_context>

<pallas_src>
import functools

import jax
import jax.numpy as jnp
from jax.experimental import pallas as pl
from jax.experimental.pallas import tpu as pltpu

_LANE = 128
_MAX_TILE = 2048
_VMEM_BUDGET = 24 * 1024 * 1024     # target working set per kernel
_VMEM_LIMIT = 32 * 1024 * 1024      # scoped VMEM limit (>= v5e default 16 MiB)
_STD_TILES = (2048, 1024, 512, 256, 128)


def _round_up(x: int, m: int) -> int:
    return ((x + m - 1) // m) * m


def _agg_vmem_bytes(tile_t, tile_k, d_p, in_bytes, out_bytes):
    """Rough double-buffered VMEM footprint of the aggregation kernel."""
    return (2 * tile_t * tile_k * in_bytes      # A tile (dominant stream)
            + 2 * tile_k * d_p * in_bytes       # XW tile
            + 2 * tile_t * d_p * in_bytes       # self term
            + 2 * tile_t * d_p * out_bytes      # output tile
            + tile_t * d_p * 4)                 # f32 accumulator scratch


def _choose_tiles(n_p, num_rel, d_p, in_bytes, out_bytes=4):
    """Pick (tile_t, tile_k) for the aggregation kernel.

    Priorities (per review): maximize tile_t first (divides XW re-read traffic),
    then tile_k (longer MXU runs, fewer acc RMWs), but keep >= 2 target tiles
    when possible (v7x megacore) and stay under the VMEM budget.
    """
    t_cands = sorted({c for c in _STD_TILES if c <= n_p and n_p % c == 0}
                     | ({n_p} if n_p <= _MAX_TILE else set()), reverse=True)
    pref = [c for c in t_cands if n_p // c >= 2]
    t_list = pref if pref else t_cands

    # Contraction tiles: divisors of n_p, plus whole-relation multiples of n_p.
    k_cands = sorted({c for c in _STD_TILES if c <= n_p and n_p % c == 0}
                     | {n_p * m for m in range(1, num_rel + 1)
                        if num_rel % m == 0 and n_p * m <= _MAX_TILE},
                     reverse=True)

    for tt in t_list:
        for tk in k_cands:
            if _agg_vmem_bytes(tt, tk, d_p, in_bytes, out_bytes) <= _VMEM_BUDGET:
                return tt, tk
    return 128, 128


# ----------------------------------------------------------------------------
# Kernel 1: per-relation message transform
#   XW[r * Np + s, :] = X[s] @ W[r]                 for r < R
#   SELF[s, :]        = X[s] @ W_self + bias        (self-loop term)
# Grid: (node tiles outer, relations inner) so the X tile stays VMEM-resident
# across all relations; only the (Dp, Dp) weight streams per step.
# ----------------------------------------------------------------------------
def _msg_transform_kernel(x_ref, w_ref, b_ref, xw_ref, self_ref):
    r = pl.program_id(1)
    num_rel = pl.num_programs(1) - 1
    res = jnp.dot(x_ref[...], w_ref[0], preferred_element_type=jnp.float32)

    @pl.when(r < num_rel)
    def _():
        xw_ref[...] = res.astype(xw_ref.dtype)

    @pl.when(r == num_rel)
    def _():
        self_ref[...] = (res + b_ref[...]).astype(self_ref.dtype)


def message_transform(x, w, bias, *, out_dtype, tile_n):
    n_p, d_p = x.shape
    num_rel = w.shape[0] - 1
    n_blocks = n_p // tile_n

    def xw_index(t, r):
        # Clamp the self-loop step onto the previously written block (revisit,
        # no kernel write) so the XW array only holds the R real relations.
        return (jnp.minimum(r, num_rel - 1) * n_blocks + t, 0)

    return pl.pallas_call(
        _msg_transform_kernel,
        out_shape=(
            jax.ShapeDtypeStruct((num_rel * n_p, d_p), out_dtype),
            jax.ShapeDtypeStruct((n_p, d_p), out_dtype),
        ),
        grid_spec=pltpu.PrefetchScalarGridSpec(
            num_scalar_prefetch=0,
            grid=(n_blocks, num_rel + 1),
            in_specs=[
                pl.BlockSpec((tile_n, d_p), lambda t, r: (t, 0)),     # X resident over r
                pl.BlockSpec((1, d_p, d_p), lambda t, r: (r, 0, 0)),  # W[r]
                pl.BlockSpec((1, d_p), lambda t, r: (0, 0)),          # bias
            ],
            out_specs=(
                pl.BlockSpec((tile_n, d_p), xw_index),
                pl.BlockSpec((tile_n, d_p), lambda t, r: (t, 0)),
            ),
        ),
        compiler_params=pltpu.CompilerParams(
            dimension_semantics=("parallel", "arbitrary"),
            vmem_limit_bytes=_VMEM_LIMIT),
    )(x, w, bias)


# ----------------------------------------------------------------------------
# Kernel 2: tiled aggregation with the relation axis folded into the reduction
#   out[t-tile] = relu( self[t-tile] + sum_k A[t-tile, k-tile] @ XW[k-tile] )
# A is (Np, R*Np) target-major, XW is (R*Np, Dp).  Grid (t, k); k is the single
# long reduction, accumulated in an f32 VMEM scratch.
# ----------------------------------------------------------------------------
def _rgcn_aggregate_kernel(a_ref, xw_ref, self_ref, o_ref, acc_ref):
    k = pl.program_id(1)

    @pl.when(k == 0)
    def _():
        # Initialize with the self-loop term (bias already folded in).
        acc_ref[...] = self_ref[...].astype(jnp.float32)

    acc_ref[...] += jnp.dot(a_ref[...], xw_ref[...],
                            preferred_element_type=jnp.float32)

    @pl.when(k == pl.num_programs(1) - 1)
    def _():
        o_ref[...] = jnp.maximum(acc_ref[...], 0.0).astype(o_ref.dtype)


def rgcn_aggregate(a_flat, xw, self_term, *, tile_t, tile_k, out_dtype):
    n_p, rk = a_flat.shape
    d_p = xw.shape[-1]
    return pl.pallas_call(
        _rgcn_aggregate_kernel,
        out_shape=jax.ShapeDtypeStruct((n_p, d_p), out_dtype),
        grid_spec=pltpu.PrefetchScalarGridSpec(
            num_scalar_prefetch=0,
            grid=(n_p // tile_t, rk // tile_k),
            in_specs=[
                pl.BlockSpec((tile_t, tile_k), lambda t, k: (t, k)),
                pl.BlockSpec((tile_k, d_p), lambda t, k: (k, 0)),
                pl.BlockSpec((tile_t, d_p), lambda t, k: (t, 0)),   # resident over k
            ],
            out_specs=pl.BlockSpec((tile_t, d_p), lambda t, k: (t, 0)),
            scratch_shapes=[pltpu.VMEM((tile_t, d_p), jnp.float32)],
        ),
        compiler_params=pltpu.CompilerParams(
            dimension_semantics=("parallel", "arbitrary"),
            vmem_limit_bytes=_VMEM_LIMIT),
    )(a_flat, xw, self_term)


# ----------------------------------------------------------------------------
# Glue (plain JAX): edge weighting + dense adjacency, bases decomposition,
# padding / layout, layer stacking, index lookup.
# ----------------------------------------------------------------------------
def build_adjacency(sources, targets, edge_types, num_entities, num_relations):
    """Dense (R, N, N) adjacency with inverse-in-degree weights (pykeen default).

    A[r, t, s] = 1 / indegree_r(t) for each edge s -r-> t (duplicates counted,
    matching the message-sum semantics).  The self loop is handled analytically
    inside the layer (no identity slice).
    """
    rel_tgt = edge_types * num_entities + targets
    counts = jnp.zeros((num_relations * num_entities,), jnp.float32).at[rel_tgt].add(1.0)
    w = 1.0 / counts[rel_tgt]
    a = jnp.zeros((num_relations, num_entities, num_entities), jnp.float32)
    a = a.at[edge_types, targets, sources].add(w)
    return a


def rgcn_representations_forward(base_emb, adjacency, layer_params, indices=None,
                                 *, compute_dtype=jnp.bfloat16):
    """Equivalent of RGCNRepresentations.forward (eval mode)."""
    n, d = base_emb.shape
    num_rel = adjacency.shape[0]
    assert num_rel >= 1

    d_p = _round_up(d, _LANE)            # lane-dense feature dim
    n_p = _round_up(n, _LANE)            # node dim padded to the (8,128) grid

    in_bytes = jnp.dtype(compute_dtype).itemsize
    tile_t, tile_k = _choose_tiles(n_p, num_rel, d_p, in_bytes)

    # Zero padding is exact: padded feature columns stay zero through W/bias
    # padding, and padded source columns of A are zero so padded nodes never
    # contaminate real rows.
    x = jnp.pad(base_emb.astype(jnp.float32),
                ((0, n_p - n), (0, d_p - d))).astype(compute_dtype)

    # (R, N, N) -> (Np, R*Np): target-major with (relation, source) fused into
    # one contraction axis, matching the (R*Np, Dp) XW layout.
    a_p = jnp.pad(adjacency, ((0, 0), (0, n_p - n), (0, n_p - n)))
    a_flat = (jnp.transpose(a_p, (1, 0, 2))
              .reshape(n_p, num_rel * n_p).astype(compute_dtype))

    # TODO(synk): tile the feature dim as well if padded D grows beyond ~1k so
    #             the (Dp, Dp) weight block stays comfortably inside VMEM.
    num_layers = len(layer_params)
    for li, (att, bases, bias) in enumerate(layer_params):
        # bases decomposition: W[r] = sum_b att[r, b] * bases[b]   (R+1, D, D)
        w = jnp.einsum("rb,bij->rij", att, bases)
        w_p = jnp.pad(w, ((0, 0), (0, d_p - d), (0, d_p - d))).astype(compute_dtype)
        b_p = jnp.pad(bias.astype(jnp.float32), ((0, 0), (0, d_p - d)))

        xw, self_term = message_transform(x, w_p, b_p,
                                          out_dtype=compute_dtype, tile_n=tile_t)
        out_dtype = jnp.float32 if li == num_layers - 1 else compute_dtype
        x = rgcn_aggregate(a_flat, xw, self_term,
                           tile_t=tile_t, tile_k=tile_k, out_dtype=out_dtype)

    x = x.astype(jnp.float32)[:n, :d]
    if indices is not None:
        x = x[indices]
    return x


if __name__ == "__main__":
    # Small synthetic "triples factory": N entities, R relations, E edges, D dim
    N, D, R, E = 32, 64, 4, 96
    NUM_LAYERS, NUM_BASES = 2, 3

    key = jax.random.PRNGKey(0)
    k_emb, k_src, k_tgt, k_rel, *k_layers = jax.random.split(key, 4 + 3 * NUM_LAYERS)

    # Base embeddings (pykeen default initializer: normal_)
    base_emb = jax.random.normal(k_emb, (N, D), jnp.float32)

    # Triples (sources, edge_types, targets)
    sources = jax.random.randint(k_src, (E,), 0, N)
    targets = jax.random.randint(k_tgt, (E,), 0, N)
    edge_types = jax.random.randint(k_rel, (E,), 0, R)

    adjacency = build_adjacency(sources, targets, edge_types, N, R)

    # Deterministic per-layer parameters: bases decomposition + bias
    layer_params = []
    for li in range(NUM_LAYERS):
        ka, kb, kc = k_layers[3 * li], k_layers[3 * li + 1], k_layers[3 * li + 2]
        att = jax.random.normal(ka, (R + 1, NUM_BASES), jnp.float32) * 0.5
        bases = jax.random.normal(kb, (NUM_BASES, D, D), jnp.float32) * (1.0 / jnp.sqrt(D))
        bias = jax.random.normal(kc, (1, D), jnp.float32) * 0.1
        layer_params.append((att, bases, bias))

    fwd_bf16 = jax.jit(functools.partial(rgcn_representations_forward,
                                         compute_dtype=jnp.bfloat16))
    fwd_f32 = jax.jit(functools.partial(rgcn_representations_forward,
                                        compute_dtype=jnp.float32))

    # forward(indices=None): all enriched entity representations, shape (N, D)
    enriched = jax.block_until_ready(fwd_bf16(base_emb, adjacency, layer_params, None))
    assert enriched.shape == (N, D) and enriched.dtype == jnp.float32

    # forward(indices): gather of enriched embeddings, shape (*indices.shape, D)
    indices = jnp.array([0, 5, 17], dtype=jnp.int32)
    picked = jax.block_until_ready(fwd_bf16(base_emb, adjacency, layer_params, indices))
    assert picked.shape == (3, D)

    # Pure-JAX f32 reference of the module's eval forward
    x_ref = base_emb
    for att, bases, bias in layer_params:
        w = jnp.einsum("rb,bij->rij", att, bases)
        msg = jnp.einsum("rts,sd,rde->te", adjacency, x_ref, w[:-1])
        x_ref = jnp.maximum(msg + x_ref @ w[-1] + bias, 0.0)

    # bf16 storage/compute path vs f32 reference (loose sanity check: A, X, W,
    # XW, self term and intermediate activations are all rounded to bf16)
    assert jnp.allclose(enriched, x_ref, rtol=1e-1, atol=1e-1)
    assert jnp.allclose(picked, x_ref[indices], rtol=1e-1, atol=1e-1)

    # f32 path reproduces the reference tightly (semantics check; MXU default
    # precision for f32 matmuls)
    enriched_f32 = jax.block_until_ready(fwd_f32(base_emb, adjacency, layer_params, None))
    assert jnp.allclose(enriched_f32, x_ref, rtol=2e-3, atol=2e-3)

    print("KERNEL_OK")
</pallas_src>

<mosaic_0001>
module attributes {stable_mosaic.version = 11 : i64} {
  func.func @_msg_transform_kernel(%arg0: i32, %arg1: i32, %arg2: memref<128x128xbf16, #tpu.memory_space<vmem>>, %arg3: memref<1x128x128xbf16, #tpu.memory_space<vmem>>, %arg4: memref<1x128xf32, #tpu.memory_space<vmem>>, %arg5: memref<128x128xbf16, #tpu.memory_space<vmem>>, %arg6: memref<128x128xbf16, #tpu.memory_space<vmem>>) attributes {dimension_semantics = [#tpu.dimension_semantics<parallel>, #tpu.dimension_semantics<arbitrary>], iteration_bounds = array<i64: 1, 5>, scalar_prefetch = 0 : i64, scratch_operands = 0 : i64, tpu.core_type = #tpu.core_type<tc>, window_params = [{transform_indices = @transform_0, window_bounds = array<i64: 128, 128>}, {transform_indices = @transform_1, window_bounds = array<i64: 1, 128, 128>}, {pipeline_mode = #tpu.pipeline_mode<synchronous>, transform_indices = @transform_2, window_bounds = array<i64: 1, 128>}, {transform_indices = @transform_3, window_bounds = array<i64: 128, 128>}, {transform_indices = @transform_4, window_bounds = array<i64: 128, 128>}]} {
    %c0 = arith.constant 0 : index
    %c0_0 = arith.constant 0 : index
    %0 = vector.load %arg2[%c0, %c0_0] : memref<128x128xbf16, #tpu.memory_space<vmem>>, vector<128x128xbf16>
    %c0_1 = arith.constant 0 : index
    %c0_2 = arith.constant 0 : index
    %c0_3 = arith.constant 0 : index
    %1 = vector.load %arg3[%c0_1, %c0_2, %c0_3] : memref<1x128x128xbf16, #tpu.memory_space<vmem>>, vector<1x128x128xbf16>
    %2 = vector.shape_cast %1 : vector<1x128x128xbf16> to vector<128x128xbf16>
    %cst = arith.constant dense<0.000000e+00> : vector<128x128xf32>
    %3 = tpu.matmul %0, %2, %cst {dimension_numbers = #tpu.dot_dimension_numbers<[1], [0], [0], [1], [0, 0, 1, 1], [], []>} : vector<128x128xbf16>, vector<128x128xbf16>, vector<128x128xf32> -> vector<128x128xf32>
    %c4_i32 = arith.constant 4 : i32
    %4 = arith.cmpi slt, %arg1, %c4_i32 : i32
    %5 = arith.extui %4 : i1 to i32
    %c0_i32 = arith.constant 0 : i32
    %6 = arith.cmpi ne, %5, %c0_i32 : i32
    scf.if %6 {
      %10 = arith.truncf %3 : vector<128x128xf32> to vector<128x128xbf16>
      %c0_6 = arith.constant 0 : index
      %c0_7 = arith.constant 0 : index
      %11 = vector.load %arg5[%c0_6, %c0_7] : memref<128x128xbf16, #tpu.memory_space<vmem>>, vector<128x128xbf16>
      tpu.vector_store %arg5[%c0_6, %c0_7], %10 {strides = array<i32>} : memref<128x128xbf16, #tpu.memory_space<vmem>>, vector<128x128xbf16>,
    } else {
    }
    %c4_i32_4 = arith.constant 4 : i32
    %7 = arith.cmpi eq, %arg1, %c4_i32_4 : i32
    %8 = arith.extui %7 : i1 to i32
    %c0_i32_5 = arith.constant 0 : i32
    %9 = arith.cmpi ne, %8, %c0_i32_5 : i32
    scf.if %9 {
      %c0_6 = arith.constant 0 : index
      %c0_7 = arith.constant 0 : index
      %10 = vector.load %arg4[%c0_6, %c0_7] : memref<1x128xf32, #tpu.memory_space<vmem>>, vector<1x128xf32>
      %11 = vector.broadcast %10 : vector<1x128xf32> to vector<128x128xf32>
      %12 = arith.addf %3, %11 : vector<128x128xf32>
      %13 = arith.truncf %12 : vector<128x128xf32> to vector<128x128xbf16>
      %c0_8 = arith.constant 0 : index
      %c0_9 = arith.constant 0 : index
      %14 = vector.load %arg6[%c0_8, %c0_9] : memref<128x128xbf16, #tpu.memory_space<vmem>>, vector<128x128xbf16>
      tpu.vector_store %arg6[%c0_8, %c0_9], %13 {strides = array<i32>} : memref<128x128xbf16, #tpu.memory_space<vmem>>, vector<128x128xbf16>,
    } else {
    }
    return
  }
  func.func @transform_0(%arg0: i32, %arg1: i32) -> (i32, i32) {
    %c0_i32 = arith.constant 0 : i32
    %c0_i32_0 = arith.constant 0 : i32
    return %arg0, %c0_i32 : i32, i32
  }
  func.func @transform_1(%arg0: i32, %arg1: i32) -> (i32, i32, i32) {
    %c0_i32 = arith.constant 0 : i32
    %c0_i32_0 = arith.constant 0 : i32
    %c0_i32_1 = arith.constant 0 : i32
    return %arg1, %c0_i32, %c0_i32_0 : i32, i32, i32
  }
  func.func @transform_2(%arg0: i32, %arg1: i32) -> (i32, i32) {
    %c0_i32 = arith.constant 0 : i32
    %c0_i32_0 = arith.constant 0 : i32
    %c0_i32_1 = arith.constant 0 : i32
    return %c0_i32, %c0_i32_0 : i32, i32
  }
  func.func @transform_3(%arg0: i32, %arg1: i32) -> (i32, i32) {
    %c3_i32 = arith.constant 3 : i32
    %0 = arith.minsi %arg1, %c3_i32 : i32
    %c1_i32 = arith.constant 1 : i32
    %1 = arith.muli %0, %c1_i32 : i32
    %2 = arith.addi %1, %arg0 : i32
    %c0_i32 = arith.constant 0 : i32
    %c0_i32_0 = arith.constant 0 : i32
    return %2, %c0_i32 : i32, i32
  }
  func.func @transform_4(%arg0: i32, %arg1: i32) -> (i32, i32) {
    %c0_i32 = arith.constant 0 : i32
    %c0_i32_0 = arith.constant 0 : i32
    return %arg0, %c0_i32 : i32, i32
  }
}

module attributes {stable_mosaic.version = 11 : i64} {
  func.func @_rgcn_aggregate_kernel(%arg0: i32, %arg1: i32, %arg2: memref<128x512xbf16, #tpu.memory_space<vmem>>, %arg3: memref<512x128xbf16, #tpu.memory_space<vmem>>, %arg4: memref<128x128xbf16, #tpu.memory_space<vmem>>, %arg5: memref<128x128xbf16, #tpu.memory_space<vmem>>, %arg6: memref<128x128xf32, #tpu.memory_space<vmem>>) attributes {dimension_semantics = [#tpu.dimension_semantics<parallel>, #tpu.dimension_semantics<arbitrary>], iteration_bounds = array<i64: 1, 1>, scalar_prefetch = 0 : i64, scratch_operands = 1 : i64, tpu.core_type = #tpu.core_type<tc>, window_params = [{transform_indices = @transform_0, window_bounds = array<i64: 128, 512>}, {transform_indices = @transform_1, window_bounds = array<i64: 512, 128>}, {transform_indices = @transform_2, window_bounds = array<i64: 128, 128>}, {transform_indices = @transform_3, window_bounds = array<i64: 128, 128>}]} {
    %c0_i32 = arith.constant 0 : i32
    %0 = arith.cmpi eq, %arg1, %c0_i32 : i32
    %1 = arith.extui %0 : i1 to i32
    %c0_i32_0 = arith.constant 0 : i32
    %2 = arith.cmpi ne, %1, %c0_i32_0 : i32
    scf.if %2 {
      %c0_10 = arith.constant 0 : index
      %c0_11 = arith.constant 0 : index
      %12 = vector.load %arg4[%c0_10, %c0_11] : memref<128x128xbf16, #tpu.memory_space<vmem>>, vector<128x128xbf16>
      %13 = arith.extf %12 : vector<128x128xbf16> to vector<128x128xf32>
      %c0_12 = arith.constant 0 : index
      %c0_13 = arith.constant 0 : index
      %14 = vector.load %arg6[%c0_12, %c0_13] : memref<128x128xf32, #tpu.memory_space<vmem>>, vector<128x128xf32>
      tpu.vector_store %arg6[%c0_12, %c0_13], %13 {strides = array<i32>} : memref<128x128xf32, #tpu.memory_space<vmem>>, vector<128x128xf32>,
    } else {
    }
    %c0 = arith.constant 0 : index
    %c0_1 = arith.constant 0 : index
    %3 = vector.load %arg6[%c0, %c0_1] : memref<128x128xf32, #tpu.memory_space<vmem>>, vector<128x128xf32>
    %c0_2 = arith.constant 0 : index
    %c0_3 = arith.constant 0 : index
    %4 = vector.load %arg2[%c0_2, %c0_3] : memref<128x512xbf16, #tpu.memory_space<vmem>>, vector<128x512xbf16>
    %c0_4 = arith.constant 0 : index
    %c0_5 = arith.constant 0 : index
    %5 = vector.load %arg3[%c0_4, %c0_5] : memref<512x128xbf16, #tpu.memory_space<vmem>>, vector<512x128xbf16>
    %cst = arith.constant dense<0.000000e+00> : vector<128x128xf32>
    %6 = tpu.matmul %4, %5, %cst {dimension_numbers = #tpu.dot_dimension_numbers<[1], [0], [0], [1], [0, 0, 1, 1], [], []>} : vector<128x512xbf16>, vector<512x128xbf16>, vector<128x128xf32> -> vector<128x128xf32>
    %7 = arith.addf %3, %6 : vector<128x128xf32>
    %c0_6 = arith.constant 0 : index
    %c0_7 = arith.constant 0 : index
    %8 = vector.load %arg6[%c0_6, %c0_7] : memref<128x128xf32, #tpu.memory_space<vmem>>, vector<128x128xf32>
    tpu.vector_store %arg6[%c0_6, %c0_7], %7 {strides = array<i32>} : memref<128x128xf32, #tpu.memory_space<vmem>>, vector<128x128xf32>,
    %c0_i32_8 = arith.constant 0 : i32
    %9 = arith.cmpi eq, %arg1, %c0_i32_8 : i32
    %10 = arith.extui %9 : i1 to i32
    %c0_i32_9 = arith.constant 0 : i32
    %11 = arith.cmpi ne, %10, %c0_i32_9 : i32
    scf.if %11 {
      %c0_10 = arith.constant 0 : index
      %c0_11 = arith.constant 0 : index
      %12 = vector.load %arg6[%c0_10, %c0_11] : memref<128x128xf32, #tpu.memory_space<vmem>>, vector<128x128xf32>
      %cst_12 = arith.constant 0.000000e+00 : f32
      %13 = vector.broadcast %cst_12 : f32 to vector<128x128xf32>
      %14 = arith.maximumf %12, %13 : vector<128x128xf32>
      %15 = arith.truncf %14 : vector<128x128xf32> to vector<128x128xbf16>
      %c0_13 = arith.constant 0 : index
      %c0_14 = arith.constant 0 : index
      %16 = vector.load %arg5[%c0_13, %c0_14] : memref<128x128xbf16, #tpu.memory_space<vmem>>, vector<128x128xbf16>
      tpu.vector_store %arg5[%c0_13, %c0_14], %15 {strides = array<i32>} : memref<128x128xbf16, #tpu.memory_space<vmem>>, vector<128x128xbf16>,
    } else {
    }
    return
  }
  func.func @transform_0(%arg0: i32, %arg1: i32) -> (i32, i32) {
    %c0_i32 = arith.constant 0 : i32
    return %arg0, %arg1 : i32, i32
  }
  func.func @transform_1(%arg0: i32, %arg1: i32) -> (i32, i32) {
    %c0_i32 = arith.constant 0 : i32
    %c0_i32_0 = arith.constant 0 : i32
    return %arg1, %c0_i32 : i32, i32
  }
  func.func @transform_2(%arg0: i32, %arg1: i32) -> (i32, i32) {
    %c0_i32 = arith.constant 0 : i32
    %c0_i32_0 = arith.constant 0 : i32
    return %arg0, %c0_i32 : i32, i32
  }
  func.func @transform_3(%arg0: i32, %arg1: i32) -> (i32, i32) {
    %c0_i32 = arith.constant 0 : i32
    %c0_i32_0 = arith.constant 0 : i32
    return %arg0, %c0_i32 : i32, i32
  }
}

module attributes {stable_mosaic.version = 11 : i64} {
  func.func @_rgcn_aggregate_kernel(%arg0: i32, %arg1: i32, %arg2: memref<128x512xbf16, #tpu.memory_space<vmem>>, %arg3: memref<512x128xbf16, #tpu.memory_space<vmem>>, %arg4: memref<128x128xbf16, #tpu.memory_space<vmem>>, %arg5: memref<128x128xf32, #tpu.memory_space<vmem>>, %arg6: memref<128x128xf32, #tpu.memory_space<vmem>>) attributes {dimension_semantics = [#tpu.dimension_semantics<parallel>, #tpu.dimension_semantics<arbitrary>], iteration_bounds = array<i64: 1, 1>, scalar_prefetch = 0 : i64, scratch_operands = 1 : i64, tpu.core_type = #tpu.core_type<tc>, window_params = [{transform_indices = @transform_0, window_bounds = array<i64: 128, 512>}, {transform_indices = @transform_1, window_bounds = array<i64: 512, 128>}, {transform_indices = @transform_2, window_bounds = array<i64: 128, 128>}, {transform_indices = @transform_3, window_bounds = array<i64: 128, 128>}]} {
    %c0_i32 = arith.constant 0 : i32
    %0 = arith.cmpi eq, %arg1, %c0_i32 : i32
    %1 = arith.extui %0 : i1 to i32
    %c0_i32_0 = arith.constant 0 : i32
    %2 = arith.cmpi ne, %1, %c0_i32_0 : i32
    scf.if %2 {
      %c0_10 = arith.constant 0 : index
      %c0_11 = arith.constant 0 : index
      %12 = vector.load %arg4[%c0_10, %c0_11] : memref<128x128xbf16, #tpu.memory_space<vmem>>, vector<128x128xbf16>
      %13 = arith.extf %12 : vector<128x128xbf16> to vector<128x128xf32>
      %c0_12 = arith.constant 0 : index
      %c0_13 = arith.constant 0 : index
      %14 = vector.load %arg6[%c0_12, %c0_13] : memref<128x128xf32, #tpu.memory_space<vmem>>, vector<128x128xf32>
      tpu.vector_store %arg6[%c0_12, %c0_13], %13 {strides = array<i32>} : memref<128x128xf32, #tpu.memory_space<vmem>>, vector<128x128xf32>,
    } else {
    }
    %c0 = arith.constant 0 : index
    %c0_1 = arith.constant 0 : index
    %3 = vector.load %arg6[%c0, %c0_1] : memref<128x128xf32, #tpu.memory_space<vmem>>, vector<128x128xf32>
    %c0_2 = arith.constant 0 : index
    %c0_3 = arith.constant 0 : index
    %4 = vector.load %arg2[%c0_2, %c0_3] : memref<128x512xbf16, #tpu.memory_space<vmem>>, vector<128x512xbf16>
    %c0_4 = arith.constant 0 : index
    %c0_5 = arith.constant 0 : index
    %5 = vector.load %arg3[%c0_4, %c0_5] : memref<512x128xbf16, #tpu.memory_space<vmem>>, vector<512x128xbf16>
    %cst = arith.constant dense<0.000000e+00> : vector<128x128xf32>
    %6 = tpu.matmul %4, %5, %cst {dimension_numbers = #tpu.dot_dimension_numbers<[1], [0], [0], [1], [0, 0, 1, 1], [], []>} : vector<128x512xbf16>, vector<512x128xbf16>, vector<128x128xf32> -> vector<128x128xf32>
    %7 = arith.addf %3, %6 : vector<128x128xf32>
    %c0_6 = arith.constant 0 : index
    %c0_7 = arith.constant 0 : index
    %8 = vector.load %arg6[%c0_6, %c0_7] : memref<128x128xf32, #tpu.memory_space<vmem>>, vector<128x128xf32>
    tpu.vector_store %arg6[%c0_6, %c0_7], %7 {strides = array<i32>} : memref<128x128xf32, #tpu.memory_space<vmem>>, vector<128x128xf32>,
    %c0_i32_8 = arith.constant 0 : i32
    %9 = arith.cmpi eq, %arg1, %c0_i32_8 : i32
    %10 = arith.extui %9 : i1 to i32
    %c0_i32_9 = arith.constant 0 : i32
    %11 = arith.cmpi ne, %10, %c0_i32_9 : i32
    scf.if %11 {
      %c0_10 = arith.constant 0 : index
      %c0_11 = arith.constant 0 : index
      %12 = vector.load %arg6[%c0_10, %c0_11] : memref<128x128xf32, #tpu.memory_space<vmem>>, vector<128x128xf32>
      %cst_12 = arith.constant 0.000000e+00 : f32
      %13 = vector.broadcast %cst_12 : f32 to vector<128x128xf32>
      %14 = arith.maximumf %12, %13 : vector<128x128xf32>
      %c0_13 = arith.constant 0 : index
      %c0_14 = arith.constant 0 : index
      %15 = vector.load %arg5[%c0_13, %c0_14] : memref<128x128xf32, #tpu.memory_space<vmem>>, vector<128x128xf32>
      tpu.vector_store %arg5[%c0_13, %c0_14], %14 {strides = array<i32>} : memref<128x128xf32, #tpu.memory_space<vmem>>, vector<128x128xf32>,
    } else {
    }
    return
  }
  func.func @transform_0(%arg0: i32, %arg1: i32) -> (i32, i32) {
    %c0_i32 = arith.constant 0 : i32
    return %arg0, %arg1 : i32, i32
  }
  func.func @transform_1(%arg0: i32, %arg1: i32) -> (i32, i32) {
    %c0_i32 = arith.constant 0 : i32
    %c0_i32_0 = arith.constant 0 : i32
    return %arg1, %c0_i32 : i32, i32
  }
  func.func @transform_2(%arg0: i32, %arg1: i32) -> (i32, i32) {
    %c0_i32 = arith.constant 0 : i32
    %c0_i32_0 = arith.constant 0 : i32
    return %arg0, %c0_i32 : i32, i32
  }
  func.func @transform_3(%arg0: i32, %arg1: i32) -> (i32, i32) {
    %c0_i32 = arith.constant 0 : i32
    %c0_i32_0 = arith.constant 0 : i32
    return %arg0, %c0_i32 : i32, i32
  }
}

</mosaic_0001>

<bundles_post_ra>
// kernel: rgcn_representations_forward.4
= control target key start
LH: loop header
LB: loop body
LE: loop exit
PB: predicated region body
PF: predicated region fallthrough
CT: control target
= control target key end

     0   :  { %s1144_s15 = smov 0   ;;  %s1146_s16 = smov 0   ;;  %s1256_s0 = inlined_call_operand.vmem [shape: bf16[128,128], index: 0, kind: input, shape index: {}]   ;;  %s1257_s1 = inlined_call_operand.vmem [shape: bf16[5,128,128], index: 1, kind: input, shape index: {}]   ;;  %s1258_s2 = inlined_call_operand.vmem [shape: f32[1,128], index: 2, kind: input, shape index: {}]   ;;  %s1259_s3 = inlined_call_operand.vmem [shape: bf16[512,128], index: 3, kind: output, shape index: {0}]   ;;  %s1260_s4 = inlined_call_operand.vmem [shape: bf16[128,128], index: 4, kind: output, shape index: {1}]  }
   0x1   :  { %s1148_s17 = smov 0  }
   0x2 LB: > { %s24_s18 = sadd.s32 1, %s1113_s16  ;;  %p804_p0 = scmp.ge.s32.totalorder %s1117_s17, 1  ;;  %s1117_s17 = sphi %s1148_s17, %s15_s17   ;;  %s1113_s16 = sphi %s1146_s16, %s1262_s16   ;;  %s1109_s15 = sphi %s1144_s15, %s1261_s15  }
   0x3   : > { %p25_p1 = scmp.ge.s32.totalorder %s24_s18, 5  ;;  %p194_p2 = scmp.lt.s32.totalorder %s1117_s17, 6 }
   0x5   : > { %s1264_s18 = smov (%p25_p1, %s24_s18), 0  ;;  %p195_p3 = pnand %p804_p0, %p194_p2 }
   0x6   : > { %p239_p4 = scmp.lt.s32.totalorder (!%p195_p3), %s1109_s15, 4  ;;  %p244_p5 = scmp.lt.s32.totalorder (!%p195_p3), %s1109_s15, 3 }
   0x7   : > { %198 = sbr.rel (%p195_p3) target bundleno = 280 (0x118), region = 32  ;;  %p825_p7 = scmp.ge.s32.totalorder (!%p195_p3), %s1109_s15, 4 }
   0xc   : > { %v1087_v0 = vld [vmem:[%s1256_s0] sm:$0xff]   ;;  %s240_s21 = scalar_select %p239_p4, %s1109_s15, 4  ;;  %v1089_v10 = vld [vmem:[%s1256_s0 + $0x8] sm:$0xff]   ;;  %v1091_v12 = vld [vmem:[%s1256_s0 + $0x10] sm:$0xff]  }
   0xd   : > { %v1088_v1 = vld [vmem:[%s1256_s0 + $0x20] sm:$0xff]   ;;  %s245_s24 = scalar_select %p244_p5, %s1109_s15, 3  ;;  %1023 = vmatprep.mubr.bf16.mxu0 %v1087_v0  ;;  %v1090_v11 = vld [vmem:[%s1256_s0 + $0x28] sm:$0xff]   ;;  %v1092_v13 = vld [vmem:[%s1256_s0 + $0x30] sm:$0xff]  }
   0xe   : > { %s864_s25 = sshll.u32 %s240_s21, 6  ;;  %1031 = vmatprep.mubr.bf16.mxu1 %v1088_v1  ;;  %v1093_v14 = vld [vmem:[%s1256_s0 + $0x18] sm:$0xff]  }
   0xf   : > { %s1177_s28 = scalar_lea.vmem %s1257_s1, %s864_s25  ;;  %s807_s29 = sshll.u32 %s245_s24, 4  ;;  %v1094_v15 = vld [vmem:[%s1256_s0 + $0x38] sm:$0xff]  }
  0x10   : > { %p248_p6 = scmp.lt.s32.totalorder %s807_s29, 63  ;;  %v1079_v2 = vld [vmem:[%s1177_s28 + $0x38] sm:$0xff]   ;;  %v1080_v3 = vld [vmem:[%s1177_s28 + $0x30] sm:$0xff]   ;;  %v1081_v4 = vld [vmem:[%s1177_s28 + $0x28] sm:$0xff]  }
  0x11   : > { %1007 = vmatprep.subr.bf16.mxu0 %v1079_v2  ;;  %1039 = vmatprep.subr.bf16.mxu1 %v1079_v2  ;;  %v1082_v5 = vld [vmem:[%s1177_s28 + $0x20] sm:$0xff]   ;;  %v1083_v6 = vld [vmem:[%s1177_s28 + $0x18] sm:$0xff]   ;;  %v1084_v7 = vld [vmem:[%s1177_s28 + $0x10] sm:$0xff]  }
  0x12   : > { %s1266_s29 = smov (!%p248_p6, %s807_s29), 63  ;;  %1008 = vmatpush3.bf16.msra.mxu0 %v1079_v2  ;;  %1047 = vmatpush3.bf16.msra.mxu1 %v1079_v2  ;;  %v1085_v8 = vld [vmem:[%s1177_s28 + $0x8] sm:$0xff]   ;;  %v1086_v9 = vld [vmem:[%s1177_s28] sm:$0xff]  }
  0x13   : > { %s808_s30 = sshll.u32 %s1266_s29, 2  ;;  %1009 = vmatprep.subr.bf16.mxu0 %v1080_v3  ;;  %1040 = vmatprep.subr.bf16.mxu1 %v1080_v3 }
  0x14   : > { %s1185_s7 = scalar_lea.vmem %s1259_s3, %s808_s30 }
  0x16   : > { %1010 = vmatpush3.bf16.msra.mxu0 %v1080_v3  ;;  %1048 = vmatpush3.bf16.msra.mxu1 %v1080_v3 }
  0x17   : > { %1011 = vmatprep.subr.bf16.mxu0 %v1081_v4  ;;  %1041 = vmatprep.subr.bf16.mxu1 %v1081_v4 }
  0x1a   : > { %1012 = vmatpush3.bf16.msra.mxu0 %v1081_v4  ;;  %1049 = vmatpush3.bf16.msra.mxu1 %v1081_v4 }
  0x1b   : > { %1013 = vmatprep.subr.bf16.mxu0 %v1082_v5  ;;  %1042 = vmatprep.subr.bf16.mxu1 %v1082_v5 }
  0x1e   : > { %1014 = vmatpush3.bf16.msra.mxu0 %v1082_v5  ;;  %1050 = vmatpush3.bf16.msra.mxu1 %v1082_v5 }
  0x1f   : > { %1015 = vmatprep.subr.bf16.mxu0 %v1083_v6  ;;  %1043 = vmatprep.subr.bf16.mxu1 %v1083_v6 }
  0x22   : > { %1016 = vmatpush3.bf16.msra.mxu0 %v1083_v6  ;;  %1051 = vmatpush3.bf16.msra.mxu1 %v1083_v6 }
  0x23   : > { %1017 = vmatprep.subr.bf16.mxu0 %v1084_v7  ;;  %1044 = vmatprep.subr.bf16.mxu1 %v1084_v7 }
  0x26   : > { %1018 = vmatpush3.bf16.msra.mxu0 %v1084_v7  ;;  %1052 = vmatpush3.bf16.msra.mxu1 %v1084_v7 }
  0x27   : > { %1019 = vmatprep.subr.bf16.mxu0 %v1085_v8  ;;  %1045 = vmatprep.subr.bf16.mxu1 %v1085_v8 }
  0x2a   : > { %1020 = vmatpush3.bf16.msra.mxu0 %v1085_v8  ;;  %1053 = vmatpush3.bf16.msra.mxu1 %v1085_v8 }
  0x2b   : > { %1021 = vmatprep.subr.bf16.mxu0 %v1086_v9  ;;  %1046 = vmatprep.subr.bf16.mxu1 %v1086_v9 }
  0x2e   : > { %1022 = vmatpush3.bf16.msra.mxu0 %v1086_v9  ;;  %1054 = vmatpush3.bf16.msra.mxu1 %v1086_v9 }
  0x31   : > { %1024 = vmatmul.mubr.bf16.vlgmr.msra.gmra.mxu0 %v1089_v10  ;;  %1032 = vmatmul.mubr.bf16.vlgmr.msra.gmra.mxu1 %v1090_v11 }
  0x32   : > { %1027 = vmatprep.mubr.bf16.mxu0 %v1091_v12  ;;  %1035 = vmatprep.mubr.bf16.mxu1 %v1092_v13 }
  0x39   : > { %1028 = vmatmul.mubr.bf16.gmra.mxu0 %v1093_v14  ;;  %1036 = vmatmul.mubr.bf16.gmra.mxu1 %v1094_v15 }
  0xf1   : > { %v1025_v16 = vpop.f32.mrf.mxu0  ;;  %v1033_v17 = vpop.f32.mrf.mxu1 }
  0xf3   : > { %v425_v18 = vpop.f32.mrf.mxu0  ;;  %v457_v19 = vpop.f32.mrf.mxu1 }
  0xf5   : > { %v1026_v20 = vpop.f32.mrf.mxu0  ;;  %v1034_v21 = vpop.f32.mrf.mxu1 }
  0xf7   : > { %v428_v22 = vpop.f32.mrf.mxu0  ;;  %v460_v23 = vpop.f32.mrf.mxu1 }
  0xf9   : > { %v1029_v24 = vpop.f32.mrf.mxu0  ;;  %v1037_v25 = vpop.f32.mrf.mxu1 }
  0xfb   : > { %v441_v26 = vpop.f32.mrf.mxu0  ;;  %v473_v27 = vpop.f32.mrf.mxu1  ;;  %491 = sbr.rel (%p825_p7) target bundleno = 262 (0x106), region = 36 }
  0xfd   : > { %v1030_v28 = vpop.f32.mrf.mxu0  ;;  %v1038_v29 = vpop.f32.mrf.mxu1 }
  0xff   : > { %v444_v30 = vpop.f32.mrf.mxu0  ;;  %v476_v31 = vpop.f32.mrf.mxu1 }
 0x100   : > { %v900_v32 = vpack.c.bf16 %v428_v22, %v425_v18  ;;  %v905_v33 = vpack.c.bf16 %v1026_v20, %v1025_v16  ;;  %v910_v34 = vpack.c.bf16 %v444_v30, %v441_v26  ;;  %v915_v35 = vpack.c.bf16 %v1030_v28, %v1029_v24 }
 0x101   : > { %v920_v36 = vpack.c.bf16 %v460_v23, %v457_v19  ;;  %v925_v37 = vpack.c.bf16 %v1034_v21, %v1033_v17  ;;  %v930_v38 = vpack.c.bf16 %v476_v31, %v473_v27  ;;  %v935_v39 = vpack.c.bf16 %v1038_v29, %v1037_v25 }
 0x102   : > { %901 = vst [vmem:[%s1185_s7] sm:$0xff] %v900_v32   ;;  %977 = vst [vmem:[%s1185_s7 + $0x8] sm:$0xff] %v905_v33  }
 0x103   : > { %978 = vst [vmem:[%s1185_s7 + $0x10] sm:$0xff] %v910_v34   ;;  %979 = vst [vmem:[%s1185_s7 + $0x18] sm:$0xff] %v915_v35  }
 0x104   : > { %980 = vst [vmem:[%s1185_s7 + $0x20] sm:$0xff] %v920_v36   ;;  %981 = vst [vmem:[%s1185_s7 + $0x28] sm:$0xff] %v925_v37  }
 0x105   : > { %982 = vst [vmem:[%s1185_s7 + $0x30] sm:$0xff] %v930_v38   ;;  %983 = vst [vmem:[%s1185_s7 + $0x38] sm:$0xff] %v935_v39  }
 0x106 PF: > { %p842_p8 = scmp.ne.s32.totalorder %s1109_s15, 4 }
 0x108   : > { %575 = sbr.rel (%p842_p8) target bundleno = 280 (0x118), region = 40 }
 0x10d   : > { %v843_v40 = vld [vmem:[%s1258_s2] ss:$0 sm:$0xff] }
 0x10e   : > { %v583_v41 = vadd.f32 %v843_v40, %v425_v18  ;;  %v584_v42 = vadd.f32 %v843_v40, %v428_v22  ;;  %v585_v43 = vadd.f32 %v1025_v16, %v843_v40  ;;  %v586_v44 = vadd.f32 %v1026_v20, %v843_v40 }
 0x10f   : > { %v587_v45 = vadd.f32 %v843_v40, %v441_v26  ;;  %v588_v46 = vadd.f32 %v843_v40, %v444_v30  ;;  %v589_v47 = vadd.f32 %v1029_v24, %v843_v40  ;;  %v590_v48 = vadd.f32 %v1030_v28, %v843_v40 }
 0x110   : > { %v940_v49 = vpack.c.bf16 %v584_v42, %v583_v41  ;;  %v945_v50 = vpack.c.bf16 %v586_v44, %v585_v43  ;;  %v591_v51 = vadd.f32 %v843_v40, %v457_v19  ;;  %v592_v52 = vadd.f32 %v843_v40, %v460_v23 }
 0x111   : > { %v950_v53 = vpack.c.bf16 %v588_v46, %v587_v45  ;;  %v955_v54 = vpack.c.bf16 %v590_v48, %v589_v47  ;;  %v593_v55 = vadd.f32 %v1033_v17, %v843_v40  ;;  %v594_v56 = vadd.f32 %v1034_v21, %v843_v40 }
 0x112   : > { %941 = vst [vmem:[%s1260_s4] sm:$0xff] %v940_v49   ;;  %984 = vst [vmem:[%s1260_s4 + $0x8] sm:$0xff] %v945_v50   ;;  %v960_v57 = vpack.c.bf16 %v592_v52, %v591_v51  ;;  %v595_v58 = vadd.f32 %v843_v40, %v473_v27  ;;  %v596_v59 = vadd.f32 %v843_v40, %v476_v31 }
 0x113   : > { %v597_v60 = vadd.f32 %v1037_v25, %v843_v40  ;;  %985 = vst [vmem:[%s1260_s4 + $0x10] sm:$0xff] %v950_v53   ;;  %986 = vst [vmem:[%s1260_s4 + $0x18] sm:$0xff] %v955_v54   ;;  %v965_v61 = vpack.c.bf16 %v594_v56, %v593_v55  ;;  %v598_v62 = vadd.f32 %v1038_v29, %v843_v40 }
 0x114   : > { %987 = vst [vmem:[%s1260_s4 + $0x20] sm:$0xff] %v960_v57   ;;  %v970_v63 = vpack.c.bf16 %v596_v59, %v595_v58 }
 0x115   : > { %988 = vst [vmem:[%s1260_s4 + $0x28] sm:$0xff] %v965_v61   ;;  %v975_v0 = vpack.c.bf16 %v598_v62, %v597_v60 }
 0x116   : > { %989 = vst [vmem:[%s1260_s4 + $0x30] sm:$0xff] %v970_v63  }
 0x117   : > { %990 = vst [vmem:[%s1260_s4 + $0x38] sm:$0xff] %v975_v0  }
 0x118 PF: > { %s15_s17 = sadd.s32 1, %s1117_s17   ;;  %s1261_s15 = smov %s1113_s16 }
 0x119   : > { %p12_p9 = scmp.ge.s32.totalorder %s15_s17, 7   ;;  %s1262_s16 = smov %s1264_s18 }
 0x11b   :  { %14 = sbr.rel (!%p12_p9) target bundleno = 2 (0x2), region = 85 }

// kernel: rgcn_representations_forward.7
= control target key start
LH: loop header
LB: loop body
LE: loop exit
PB: predicated region body
PF: predicated region fallthrough
CT: control target
= control target key end

     0   :  { %s1407_s1 = inlined_call_operand.vmem [shape: bf16[512,128], index: 1, kind: input, shape index: {}]   ;;  %s1408_s0 = inlined_call_operand.vmem [shape: bf16[128,512], index: 0, kind: input, shape index: {}]   ;;  %s1409_s2 = inlined_call_operand.vmem [shape: bf16[128,128], index: 2, kind: input, shape index: {}]   ;;  %s1410_s3 = inlined_call_operand.vmem [shape: f32[128,128], index: 3, kind: output, shape index: {}]  }
   0x1   :  { %v1043_v0 = vld [vmem:[%s1407_s1 + $0x78] sm:$0xff]   ;;  %v1047_v4 = vld [vmem:[%s1407_s1 + $0x70] sm:$0xff]   ;;  %v1051_v8 = vld [vmem:[%s1407_s1 + $0x68] sm:$0xff]  }
   0x2   :  { %v1044_v1 = vld [vmem:[%s1407_s1 + $0xf8] sm:$0xff]   ;;  %915 = vmatprep.subr.bf16.mxu0 %v1043_v0  ;;  %v1048_v5 = vld [vmem:[%s1407_s1 + $0xf0] sm:$0xff]   ;;  %v1052_v9 = vld [vmem:[%s1407_s1 + $0xe8] sm:$0xff]  }
   0x3   :  { %v1045_v2 = vld [vmem:[%s1407_s1 + $0x38] sm:$0xff]   ;;  %979 = vmatprep.subr.bf16.mxu1 %v1044_v1  ;;  %v1049_v6 = vld [vmem:[%s1407_s1 + $0x30] sm:$0xff]   ;;  %v1053_v10 = vld [vmem:[%s1407_s1 + $0x28] sm:$0xff]  }
   0x4   :  { %v1046_v3 = vld [vmem:[%s1407_s1 + $0xb8] sm:$0xff]   ;;  %916 = vmatpush3.bf16.msra.mxu0 %v1045_v2  ;;  %v1050_v7 = vld [vmem:[%s1407_s1 + $0xb0] sm:$0xff]   ;;  %v1054_v11 = vld [vmem:[%s1407_s1 + $0xa8] sm:$0xff]  }
   0x5   :  { %980 = vmatpush3.bf16.msra.mxu1 %v1046_v3  ;;  %917 = vmatprep.subr.bf16.mxu0 %v1047_v4  ;;  %v1055_v12 = vld [vmem:[%s1407_s1 + $0x60] sm:$0xff]   ;;  %v1059_v16 = vld [vmem:[%s1407_s1 + $0x58] sm:$0xff]   ;;  %v1063_v20 = vld [vmem:[%s1407_s1 + $0x50] sm:$0xff]  }
   0x6   :  { %981 = vmatprep.subr.bf16.mxu1 %v1048_v5  ;;  %v1056_v13 = vld [vmem:[%s1407_s1 + $0xe0] sm:$0xff]   ;;  %v1060_v17 = vld [vmem:[%s1407_s1 + $0xd8] sm:$0xff]   ;;  %v1064_v21 = vld [vmem:[%s1407_s1 + $0xd0] sm:$0xff]  }
   0x7   :  { %v1057_v14 = vld [vmem:[%s1407_s1 + $0x20] sm:$0xff]   ;;  %v1061_v18 = vld [vmem:[%s1407_s1 + $0x18] sm:$0xff]   ;;  %v1065_v22 = vld [vmem:[%s1407_s1 + $0x10] sm:$0xff]  }
   0x8   :  { %918 = vmatpush3.bf16.msra.mxu0 %v1049_v6  ;;  %v1058_v15 = vld [vmem:[%s1407_s1 + $0xa0] sm:$0xff]   ;;  %v1062_v19 = vld [vmem:[%s1407_s1 + $0x98] sm:$0xff]   ;;  %v1066_v23 = vld [vmem:[%s1407_s1 + $0x90] sm:$0xff]  }
   0x9   :  { %982 = vmatpush3.bf16.msra.mxu1 %v1050_v7  ;;  %919 = vmatprep.subr.bf16.mxu0 %v1051_v8  ;;  %v1067_v24 = vld [vmem:[%s1407_s1 + $0x48] sm:$0xff]   ;;  %v1071_v28 = vld [vmem:[%s1407_s1 + $0x40] sm:$0xff]  }
   0xa   :  { %983 = vmatprep.subr.bf16.mxu1 %v1052_v9  ;;  %v1068_v25 = vld [vmem:[%s1407_s1 + $0xc8] sm:$0xff]   ;;  %v1072_v29 = vld [vmem:[%s1407_s1 + $0xc0] sm:$0xff]  }
   0xb   :  { %v1069_v26 = vld [vmem:[%s1407_s1 + $0x8] sm:$0xff]   ;;  %v1073_v30 = vld [vmem:[%s1407_s1] sm:$0xff]  }
   0xc   :  { %920 = vmatpush3.bf16.msra.mxu0 %v1053_v10  ;;  %v1070_v27 = vld [vmem:[%s1407_s1 + $0x88] sm:$0xff]   ;;  %v1074_v31 = vld [vmem:[%s1407_s1 + $0x80] sm:$0xff]  }
   0xd   :  { %984 = vmatpush3.bf16.msra.mxu1 %v1054_v11  ;;  %921 = vmatprep.subr.bf16.mxu0 %v1055_v12  ;;  %v1075_v32 = vld [vmem:[%s1408_s0] ss:$16 sps:$4 sm:$0xff]   ;;  %v1077_v33 = vld [vmem:[%s1408_s0 + $0x4] ss:$16 sps:$4 sm:$0xff]   ;;  %v1078_v34 = vld [vmem:[%s1408_s0 + $0x8] ss:$16 sps:$4 sm:$0xff]  }
   0xe   :  { %985 = vmatprep.subr.bf16.mxu1 %v1056_v13  ;;  %v1080_v35 = vld [vmem:[%s1408_s0 + $0xc] ss:$16 sps:$4 sm:$0xff]   ;;  %563 = vmatprep.mubr.bf16.mxu0 %v1077_v33  ;;  %v1081_v36 = vld [vmem:[%s1408_s0 + $0x24] ss:$16 sps:$4 sm:$0xff]   ;;  %v1085_v38 = vld [vmem:[%s1408_s0 + $0x20] ss:$16 sps:$4 sm:$0xff]  }
   0xf   :  { %660 = vmatprep.mubr.bf16.mxu1 %v1080_v35  ;;  %v1083_v37 = vld [vmem:[%s1408_s0 + $0x2c] ss:$16 sps:$4 sm:$0xff]   ;;  %v1086_v39 = vld [vmem:[%s1408_s0 + $0x28] ss:$16 sps:$4 sm:$0xff]   ;;  %v1087_v40 = vld [vmem:[%s1408_s0 + $0x44] ss:$16 sps:$4 sm:$0xff]  }
  0x10   :  { %922 = vmatpush3.bf16.msra.mxu0 %v1057_v14  ;;  %v1089_v41 = vld [vmem:[%s1408_s0 + $0x4c] ss:$16 sps:$4 sm:$0xff]   ;;  %v1091_v42 = vld [vmem:[%s1408_s0 + $0x40] ss:$16 sps:$4 sm:$0xff]   ;;  %v1092_v43 = vld [vmem:[%s1408_s0 + $0x48] ss:$16 sps:$4 sm:$0xff]  }
  0x11   :  { %986 = vmatpush3.bf16.msra.mxu1 %v1058_v15  ;;  %923 = vmatprep.subr.bf16.mxu0 %v1059_v16  ;;  %v1093_v44 = vld [vmem:[%s1408_s0 + $0x64] ss:$16 sps:$4 sm:$0xff]   ;;  %v1095_v45 = vld [vmem:[%s1408_s0 + $0x6c] ss:$16 sps:$4 sm:$0xff]   ;;  %v1097_v46 = vld [vmem:[%s1408_s0 + $0x60] ss:$16 sps:$4 sm:$0xff]  }
  0x12   :  { %987 = vmatprep.subr.bf16.mxu1 %v1060_v17  ;;  %v1098_v47 = vld [vmem:[%s1408_s0 + $0x68] ss:$16 sps:$4 sm:$0xff]   ;;  %v1099_v48 = vld [vmem:[%s1408_s0 + $0x84] ss:$16 sps:$4 sm:$0xff]   ;;  %v1101_v49 = vld [vmem:[%s1408_s0 + $0x8c] ss:$16 sps:$4 sm:$0xff]  }
  0x13   :  { %v1103_v50 = vld [vmem:[%s1408_s0 + $0x80] ss:$16 sps:$4 sm:$0xff]   ;;  %v1104_v51 = vld [vmem:[%s1408_s0 + $0x88] ss:$16 sps:$4 sm:$0xff]   ;;  %v1105_v52 = vld [vmem:[%s1408_s0 + $0xa4] ss:$16 sps:$4 sm:$0xff]  }
  0x14   :  { %924 = vmatpush3.bf16.msra.mxu0 %v1061_v18  ;;  %v1107_v53 = vld [vmem:[%s1408_s0 + $0xac] ss:$16 sps:$4 sm:$0xff]   ;;  %v1109_v54 = vld [vmem:[%s1408_s0 + $0xa0] ss:$16 sps:$4 sm:$0xff]   ;;  %v1110_v55 = vld [vmem:[%s1408_s0 + $0xa8] ss:$16 sps:$4 sm:$0xff]  }
  0x15   :  { %988 = vmatpush3.bf16.msra.mxu1 %v1062_v19  ;;  %925 = vmatprep.subr.bf16.mxu0 %v1063_v20  ;;  %v1111_v56 = vld [vmem:[%s1408_s0 + $0xc4] ss:$16 sps:$4 sm:$0xff]   ;;  %v1113_v57 = vld [vmem:[%s1408_s0 + $0xcc] ss:$16 sps:$4 sm:$0xff]   ;;  %v1115_v58 = vld [vmem:[%s1408_s0 + $0xc0] ss:$16 sps:$4 sm:$0xff]  }
  0x16   :  { %989 = vmatprep.subr.bf16.mxu1 %v1064_v21  ;;  %v1116_v59 = vld [vmem:[%s1408_s0 + $0xc8] ss:$16 sps:$4 sm:$0xff]   ;;  %v1117_v60 = vld [vmem:[%s1408_s0 + $0xe4] ss:$16 sps:$4 sm:$0xff]   ;;  %v1119_v61 = vld [vmem:[%s1408_s0 + $0xec] ss:$16 sps:$4 sm:$0xff]  }
  0x17   :  { %v1121_v62 = vld [vmem:[%s1408_s0 + $0xe0] ss:$16 sps:$4 sm:$0xff]   ;;  %v1122_v63 = vld [vmem:[%s1408_s0 + $0xe8] ss:$16 sps:$4 sm:$0xff]  }
  0x18   :  { %926 = vmatpush3.bf16.msra.mxu0 %v1065_v22  ;;  %v877_v2 = vld [vmem:[%s1409_s2] sm:$0xff]   ;;  %v908_v19 = vld [vmem:[%s1409_s2 + $0x8] sm:$0xff]  }
  0x19   :  { %990 = vmatpush3.bf16.msra.mxu1 %v1066_v23  ;;  %927 = vmatprep.subr.bf16.mxu0 %v1067_v24  ;;  %v878_v6 = vunpack.c.l.bf16 %v877_v2  ;;  %v879_v15 = vunpack.c.h.bf16 %v877_v2 }
  0x1a   :  { %991 = vmatprep.subr.bf16.mxu1 %v1068_v25 }
  0x1c   :  { %928 = vmatpush3.bf16.msra.mxu0 %v1069_v26  ;;  %v882_v26 = vunpack.c.l.bf16 %v908_v19 }
  0x1d   :  { %992 = vmatpush3.bf16.msra.mxu1 %v1070_v27  ;;  %929 = vmatprep.subr.bf16.mxu0 %v1071_v28 }
  0x1e   :  { %993 = vmatprep.subr.bf16.mxu1 %v1072_v29 }
  0x20   :  { %930 = vmatpush3.bf16.msra.mxu0 %v1073_v30 }
  0x21   :  { %994 = vmatpush3.bf16.msra.mxu1 %v1074_v31 }
  0x23   :  { %564 = vmatmul.mubr.bf16.vlgmr.msra.gmra.mxu0 %v1075_v32 }
  0x24   :  { %661 = vmatmul.mubr.bf16.vlgmr.msra.gmra.mxu1 %v1078_v34  ;;  %571 = vmatprep.mubr.bf16.mxu0 %v1081_v36  ;;  %v883_v36 = vunpack.c.h.bf16 %v908_v19 }
  0x25   :  { %668 = vmatprep.mubr.bf16.mxu1 %v1083_v37 }
  0x2b   :  { %572 = vmatmul.mubr.bf16.gmra.mxu0 %v1085_v38 }
  0x2c   :  { %669 = vmatmul.mubr.bf16.gmra.mxu1 %v1086_v39  ;;  %579 = vmatprep.mubr.bf16.mxu0 %v1087_v40  ;;  %v909_v40 = vld [vmem:[%s1409_s2 + $0x10] sm:$0xff]  }
  0x2d   :  { %676 = vmatprep.mubr.bf16.mxu1 %v1089_v41 }
  0x33   :  { %580 = vmatmul.mubr.bf16.gmra.mxu0 %v1091_v42 }
  0x34   :  { %677 = vmatmul.mubr.bf16.gmra.mxu1 %v1092_v43  ;;  %587 = vmatprep.mubr.bf16.mxu0 %v1093_v44 }
  0x35   :  { %684 = vmatprep.mubr.bf16.mxu1 %v1095_v45 }
  0x3b   :  { %588 = vmatmul.mubr.bf16.gmra.mxu0 %v1097_v46 }
  0x3c   :  { %685 = vmatmul.mubr.bf16.gmra.mxu1 %v1098_v47  ;;  %595 = vmatprep.mubr.bf16.mxu0 %v1099_v48  ;;  %v886_v47 = vunpack.c.l.bf16 %v909_v40 }
  0x3d   :  { %692 = vmatprep.mubr.bf16.mxu1 %v1101_v49 }
  0x43   :  { %596 = vmatmul.mubr.bf16.gmra.mxu0 %v1103_v50 }
  0x44   :  { %693 = vmatmul.mubr.bf16.gmra.mxu1 %v1104_v51  ;;  %603 = vmatprep.mubr.bf16.mxu0 %v1105_v52 }
  0x45   :  { %700 = vmatprep.mubr.bf16.mxu1 %v1107_v53 }
  0x4b   :  { %604 = vmatmul.mubr.bf16.gmra.mxu0 %v1109_v54 }
  0x4c   :  { %701 = vmatmul.mubr.bf16.gmra.mxu1 %v1110_v55  ;;  %611 = vmatprep.mubr.bf16.mxu0 %v1111_v56 }
  0x4d   :  { %708 = vmatprep.mubr.bf16.mxu1 %v1113_v57  ;;  %v887_v57 = vunpack.c.h.bf16 %v909_v40 }
  0x53   :  { %612 = vmatmul.mubr.bf16.gmra.mxu0 %v1115_v58 }
  0x54   :  { %709 = vmatmul.mubr.bf16.gmra.mxu1 %v1116_v59  ;;  %619 = vmatprep.mubr.bf16.mxu0 %v1117_v60 }
  0x55   :  { %716 = vmatprep.mubr.bf16.mxu1 %v1119_v61  ;;  %v910_v61 = vld [vmem:[%s1409_s2 + $0x18] sm:$0xff]  }
  0x5b   :  { %620 = vmatmul.mubr.bf16.gmra.mxu0 %v1121_v62 }
  0x5c   :  { %717 = vmatmul.mubr.bf16.gmra.mxu1 %v1122_v63 }
  0xe3   :  { %v931_v0 = vpop.f32.mrf.mxu0 }
  0xe4   :  { %v995_v1 = vpop.f32.mrf.mxu1 }
  0xe5   :  { %v932_v3 = vpop.f32.mrf.mxu0 }
  0xe6   :  { %v933_v4 = vadd.f32 %v932_v3, %v931_v0  ;;  %v996_v5 = vpop.f32.mrf.mxu1 }
  0xe7   :  { %v997_v7 = vadd.f32 %v996_v5, %v995_v1  ;;  %v934_v8 = vpop.f32.mrf.mxu0 }
  0xe8   :  { %v998_v9 = vpop.f32.mrf.mxu1 }
  0xe9   :  { %v663_v10 = vadd.f32 %v997_v7, %v933_v4  ;;  %v935_v11 = vpop.f32.mrf.mxu0  ;;  %v890_v4 = vunpack.c.l.bf16 %v910_v61 }
  0xea   :  { %v936_v12 = vadd.f32 %v935_v11, %v934_v8  ;;  %v999_v13 = vpop.f32.mrf.mxu1 }
  0xeb   :  { %v725_v14 = vadd.f32 %v878_v6, %v663_v10  ;;  %v1000_v16 = vadd.f32 %v999_v13, %v998_v9  ;;  %v937_v17 = vpop.f32.mrf.mxu0 }
  0xec   :  { %v1001_v18 = vpop.f32.mrf.mxu1 }
  0xed   :  { %v776_v20 = vmax.f32 %v725_v14, 0.0  ;;  %v666_v21 = vadd.f32 %v1000_v16, %v936_v12  ;;  %v938_v22 = vpop.f32.mrf.mxu0  ;;  %v891_v14 = vunpack.c.h.bf16 %v910_v61 }
  0xee   :  { %v939_v23 = vadd.f32 %v938_v22, %v937_v17  ;;  %v1002_v24 = vpop.f32.mrf.mxu1 }
  0xef   :  { %792 = vst [vmem:[%s1410_s3] sm:$0xff] %v776_v20  ;;  %v726_v25 = vadd.f32 %v879_v15, %v666_v21  ;;  %v1003_v27 = vadd.f32 %v1002_v24, %v1001_v18  ;;  %v940_v28 = vpop.f32.mrf.mxu0  ;;  %v911_v18 = vld [vmem:[%s1409_s2 + $0x20] sm:$0xff]  }
  0xf0   :  { %v1004_v29 = vpop.f32.mrf.mxu1 }
  0xf1   :  { %v777_v30 = vmax.f32 %v726_v25, 0.0  ;;  %v671_v31 = vadd.f32 %v1003_v27, %v939_v23  ;;  %v941_v32 = vpop.f32.mrf.mxu0  ;;  %v894_v25 = vunpack.c.l.bf16 %v911_v18 }
  0xf2   :  { %v942_v33 = vadd.f32 %v941_v32, %v940_v28  ;;  %v1005_v34 = vpop.f32.mrf.mxu1 }
  0xf3   :  { %793 = vst [vmem:[%s1410_s3 + $0x8] sm:$0xff] %v777_v30  ;;  %v727_v35 = vadd.f32 %v882_v26, %v671_v31  ;;  %v1006_v37 = vadd.f32 %v1005_v34, %v1004_v29  ;;  %v943_v38 = vpop.f32.mrf.mxu0 }
  0xf4   :  { %v1007_v39 = vpop.f32.mrf.mxu1 }
  0xf5   :  { %v778_v41 = vmax.f32 %v727_v35, 0.0  ;;  %v674_v42 = vadd.f32 %v1006_v37, %v942_v33  ;;  %v944_v43 = vpop.f32.mrf.mxu0  ;;  %v895_v35 = vunpack.c.h.bf16 %v911_v18 }
  0xf6   :  { %v945_v44 = vadd.f32 %v944_v43, %v943_v38  ;;  %v1008_v45 = vpop.f32.mrf.mxu1 }
  0xf7   :  { %794 = vst [vmem:[%s1410_s3 + $0x10] sm:$0xff] %v778_v41  ;;  %v728_v46 = vadd.f32 %v883_v36, %v674_v42  ;;  %v1009_v48 = vadd.f32 %v1008_v45, %v1007_v39  ;;  %v946_v49 = vpop.f32.mrf.mxu0  ;;  %v912_v39 = vld [vmem:[%s1409_s2 + $0x28] sm:$0xff]  }
  0xf8   :  { %v1010_v50 = vpop.f32.mrf.mxu1 }
  0xf9   :  { %v779_v51 = vmax.f32 %v728_v46, 0.0  ;;  %v679_v52 = vadd.f32 %v1009_v48, %v945_v44  ;;  %v947_v53 = vpop.f32.mrf.mxu0  ;;  %v898_v46 = vunpack.c.l.bf16 %v912_v39 }
  0xfa   :  { %v948_v54 = vadd.f32 %v947_v53, %v946_v49  ;;  %v1011_v55 = vpop.f32.mrf.mxu1 }
  0xfb   :  { %795 = vst [vmem:[%s1410_s3 + $0x18] sm:$0xff] %v779_v51  ;;  %v729_v56 = vadd.f32 %v886_v47, %v679_v52  ;;  %v1012_v58 = vadd.f32 %v1011_v55, %v1010_v50  ;;  %v949_v59 = vpop.f32.mrf.mxu0 }
  0xfc   :  { %v1013_v60 = vpop.f32.mrf.mxu1 }
  0xfd   :  { %v780_v62 = vmax.f32 %v729_v56, 0.0  ;;  %v682_v63 = vadd.f32 %v1012_v58, %v948_v54  ;;  %v950_v0 = vpop.f32.mrf.mxu0  ;;  %v899_v56 = vunpack.c.h.bf16 %v912_v39 }
  0xfe   :  { %v951_v1 = vadd.f32 %v950_v0, %v949_v59  ;;  %v1014_v2 = vpop.f32.mrf.mxu1 }
  0xff   :  { %796 = vst [vmem:[%s1410_s3 + $0x20] sm:$0xff] %v780_v62  ;;  %v730_v3 = vadd.f32 %v887_v57, %v682_v63  ;;  %v1015_v5 = vadd.f32 %v1014_v2, %v1013_v60  ;;  %v952_v6 = vpop.f32.mrf.mxu0  ;;  %v913_v60 = vld [vmem:[%s1409_s2 + $0x30] sm:$0xff]  }
 0x100   :  { %v1016_v7 = vpop.f32.mrf.mxu1 }
 0x101   :  { %v781_v8 = vmax.f32 %v730_v3, 0.0  ;;  %v687_v9 = vadd.f32 %v1015_v5, %v951_v1  ;;  %v953_v10 = vpop.f32.mrf.mxu0  ;;  %v902_v3 = vunpack.c.l.bf16 %v913_v60 }
 0x102   :  { %v954_v11 = vadd.f32 %v953_v10, %v952_v6  ;;  %v1017_v12 = vpop.f32.mrf.mxu1 }
 0x103   :  { %797 = vst [vmem:[%s1410_s3 + $0x28] sm:$0xff] %v781_v8  ;;  %v731_v13 = vadd.f32 %v890_v4, %v687_v9  ;;  %v1018_v15 = vadd.f32 %v1017_v12, %v1016_v7  ;;  %v955_v16 = vpop.f32.mrf.mxu0 }
 0x104   :  { %v1019_v17 = vpop.f32.mrf.mxu1 }
 0x105   :  { %v782_v19 = vmax.f32 %v731_v13, 0.0  ;;  %v690_v20 = vadd.f32 %v1018_v15, %v954_v11  ;;  %v956_v21 = vpop.f32.mrf.mxu0  ;;  %v903_v13 = vunpack.c.h.bf16 %v913_v60 }
 0x106   :  { %v957_v22 = vadd.f32 %v956_v21, %v955_v16  ;;  %v1020_v23 = vpop.f32.mrf.mxu1 }
 0x107   :  { %798 = vst [vmem:[%s1410_s3 + $0x30] sm:$0xff] %v782_v19  ;;  %v732_v24 = vadd.f32 %v891_v14, %v690_v20  ;;  %v1021_v26 = vadd.f32 %v1020_v23, %v1019_v17  ;;  %v958_v27 = vpop.f32.mrf.mxu0  ;;  %v914_v17 = vld [vmem:[%s1409_s2 + $0x38] sm:$0xff]  }
 0x108   :  { %v1022_v28 = vpop.f32.mrf.mxu1 }
 0x109   :  { %v783_v29 = vmax.f32 %v732_v24, 0.0  ;;  %v695_v30 = vadd.f32 %v1021_v26, %v957_v22  ;;  %v959_v31 = vpop.f32.mrf.mxu0  ;;  %v906_v24 = vunpack.c.l.bf16 %v914_v17 }
 0x10a   :  { %v960_v32 = vadd.f32 %v959_v31, %v958_v27  ;;  %v1023_v33 = vpop.f32.mrf.mxu1 }
 0x10b   :  { %799 = vst [vmem:[%s1410_s3 + $0x38] sm:$0xff] %v783_v29  ;;  %v733_v34 = vadd.f32 %v894_v25, %v695_v30  ;;  %v1024_v36 = vadd.f32 %v1023_v33, %v1022_v28  ;;  %v961_v37 = vpop.f32.mrf.mxu0 }
 0x10c   :  { %v1025_v38 = vpop.f32.mrf.mxu1 }
 0x10d   :  { %v784_v40 = vmax.f32 %v733_v34, 0.0  ;;  %v698_v41 = vadd.f32 %v1024_v36, %v960_v32  ;;  %v962_v42 = vpop.f32.mrf.mxu0  ;;  %v907_v34 = vunpack.c.h.bf16 %v914_v17 }
 0x10e   :  { %v963_v43 = vadd.f32 %v962_v42, %v961_v37  ;;  %v1026_v44 = vpop.f32.mrf.mxu1 }
 0x10f   :  { %800 = vst [vmem:[%s1410_s3 + $0x40] sm:$0xff] %v784_v40  ;;  %v734_v45 = vadd.f32 %v895_v35, %v698_v41  ;;  %v1027_v47 = vadd.f32 %v1026_v44, %v1025_v38  ;;  %v964_v48 = vpop.f32.mrf.mxu0 }
 0x110   :  { %v1028_v49 = vpop.f32.mrf.mxu1 }
 0x111   :  { %v785_v50 = vmax.f32 %v734_v45, 0.0  ;;  %v703_v51 = vadd.f32 %v1027_v47, %v963_v43  ;;  %v965_v52 = vpop.f32.mrf.mxu0 }
 0x112   :  { %v966_v53 = vadd.f32 %v965_v52, %v964_v48  ;;  %v1029_v54 = vpop.f32.mrf.mxu1 }
 0x113   :  { %801 = vst [vmem:[%s1410_s3 + $0x48] sm:$0xff] %v785_v50  ;;  %v735_v55 = vadd.f32 %v898_v46, %v703_v51  ;;  %v1030_v57 = vadd.f32 %v1029_v54, %v1028_v49  ;;  %v967_v58 = vpop.f32.mrf.mxu0 }
 0x114   :  { %v1031_v59 = vpop.f32.mrf.mxu1 }
 0x115   :  { %v786_v61 = vmax.f32 %v735_v55, 0.0  ;;  %v706_v62 = vadd.f32 %v1030_v57, %v966_v53  ;;  %v968_v63 = vpop.f32.mrf.mxu0 }
 0x116   :  { %v969_v0 = vadd.f32 %v968_v63, %v967_v58  ;;  %v1032_v1 = vpop.f32.mrf.mxu1 }
 0x117   :  { %802 = vst [vmem:[%s1410_s3 + $0x50] sm:$0xff] %v786_v61  ;;  %v736_v2 = vadd.f32 %v899_v56, %v706_v62  ;;  %v1033_v4 = vadd.f32 %v1032_v1, %v1031_v59  ;;  %v970_v5 = vpop.f32.mrf.mxu0 }
 0x118   :  { %v1034_v6 = vpop.f32.mrf.mxu1 }
 0x119   :  { %v787_v7 = vmax.f32 %v736_v2, 0.0  ;;  %v711_v8 = vadd.f32 %v1033_v4, %v969_v0  ;;  %v971_v9 = vpop.f32.mrf.mxu0 }
 0x11a   :  { %v972_v10 = vadd.f32 %v971_v9, %v970_v5  ;;  %v1035_v11 = vpop.f32.mrf.mxu1 }
 0x11b   :  { %803 = vst [vmem:[%s1410_s3 + $0x58] sm:$0xff] %v787_v7  ;;  %v737_v12 = vadd.f32 %v902_v3, %v711_v8  ;;  %v1036_v14 = vadd.f32 %v1035_v11, %v1034_v6  ;;  %v973_v15 = vpop.f32.mrf.mxu0 }
 0x11c   :  { %v1037_v16 = vpop.f32.mrf.mxu1 }
 0x11d   :  { %v788_v18 = vmax.f32 %v737_v12, 0.0  ;;  %v714_v19 = vadd.f32 %v1036_v14, %v972_v10  ;;  %v974_v20 = vpop.f32.mrf.mxu0 }
 0x11e   :  { %v975_v21 = vadd.f32 %v974_v20, %v973_v15  ;;  %v1038_v22 = vpop.f32.mrf.mxu1 }
 0x11f   :  { %804 = vst [vmem:[%s1410_s3 + $0x60] sm:$0xff] %v788_v18  ;;  %v738_v23 = vadd.f32 %v903_v13, %v714_v19  ;;  %v1039_v25 = vadd.f32 %v1038_v22, %v1037_v16  ;;  %v976_v26 = vpop.f32.mrf.mxu0 }
 0x120   :  { %v1040_v27 = vpop.f32.mrf.mxu1 }
 0x121   :  { %v789_v28 = vmax.f32 %v738_v23, 0.0  ;;  %v719_v29 = vadd.f32 %v1039_v25, %v975_v21  ;;  %v977_v30 = vpop.f32.mrf.mxu0 }
 0x122   :  { %v978_v31 = vadd.f32 %v977_v30, %v976_v26  ;;  %v1041_v32 = vpop.f32.mrf.mxu1 }
 0x123   :  { %805 = vst [vmem:[%s1410_s3 + $0x68] sm:$0xff] %v789_v28  ;;  %v739_v33 = vadd.f32 %v906_v24, %v719_v29  ;;  %v1042_v35 = vadd.f32 %v1041_v32, %v1040_v27 }
 0x125   :  { %v790_v36 = vmax.f32 %v739_v33, 0.0  ;;  %v722_v37 = vadd.f32 %v1042_v35, %v978_v31 }
 0x127   :  { %806 = vst [vmem:[%s1410_s3 + $0x70] sm:$0xff] %v790_v36  ;;  %v740_v38 = vadd.f32 %v907_v34, %v722_v37 }
 0x129   :  { %v791_v39 = vmax.f32 %v740_v38, 0.0 }
 0x12b   :  { %807 = vst [vmem:[%s1410_s3 + $0x78] sm:$0xff] %v791_v39 }

// kernel: rgcn_representations_forward.5
= control target key start
LH: loop header
LB: loop body
LE: loop exit
PB: predicated region body
PF: predicated region fallthrough
CT: control target
= control target key end

     0   :  { %s1526_s1 = inlined_call_operand.vmem [shape: bf16[512,128], index: 1, kind: input, shape index: {}]   ;;  %s1527_s0 = inlined_call_operand.vmem [shape: bf16[128,512], index: 0, kind: input, shape index: {}]   ;;  %s1528_s2 = inlined_call_operand.vmem [shape: bf16[128,128], index: 2, kind: input, shape index: {}]   ;;  %s1529_s3 = inlined_call_operand.vmem [shape: bf16[128,128], index: 3, kind: output, shape index: {}]  }
   0x1   :  { %v1186_v0 = vld [vmem:[%s1526_s1 + $0x78] sm:$0xff]   ;;  %v1190_v4 = vld [vmem:[%s1526_s1 + $0x70] sm:$0xff]   ;;  %v1194_v8 = vld [vmem:[%s1526_s1 + $0x68] sm:$0xff]  }
   0x2   :  { %v1187_v1 = vld [vmem:[%s1526_s1 + $0xf8] sm:$0xff]   ;;  %1058 = vmatprep.subr.bf16.mxu0 %v1186_v0  ;;  %v1191_v5 = vld [vmem:[%s1526_s1 + $0xf0] sm:$0xff]   ;;  %v1195_v9 = vld [vmem:[%s1526_s1 + $0xe8] sm:$0xff]  }
   0x3   :  { %v1188_v2 = vld [vmem:[%s1526_s1 + $0x38] sm:$0xff]   ;;  %1122 = vmatprep.subr.bf16.mxu1 %v1187_v1  ;;  %v1192_v6 = vld [vmem:[%s1526_s1 + $0x30] sm:$0xff]   ;;  %v1196_v10 = vld [vmem:[%s1526_s1 + $0x28] sm:$0xff]  }
   0x4   :  { %v1189_v3 = vld [vmem:[%s1526_s1 + $0xb8] sm:$0xff]   ;;  %1059 = vmatpush3.bf16.msra.mxu0 %v1188_v2  ;;  %v1193_v7 = vld [vmem:[%s1526_s1 + $0xb0] sm:$0xff]   ;;  %v1197_v11 = vld [vmem:[%s1526_s1 + $0xa8] sm:$0xff]  }
   0x5   :  { %1123 = vmatpush3.bf16.msra.mxu1 %v1189_v3  ;;  %1060 = vmatprep.subr.bf16.mxu0 %v1190_v4  ;;  %v1198_v12 = vld [vmem:[%s1526_s1 + $0x60] sm:$0xff]   ;;  %v1202_v16 = vld [vmem:[%s1526_s1 + $0x58] sm:$0xff]   ;;  %v1206_v20 = vld [vmem:[%s1526_s1 + $0x50] sm:$0xff]  }
   0x6   :  { %1124 = vmatprep.subr.bf16.mxu1 %v1191_v5  ;;  %v1199_v13 = vld [vmem:[%s1526_s1 + $0xe0] sm:$0xff]   ;;  %v1203_v17 = vld [vmem:[%s1526_s1 + $0xd8] sm:$0xff]   ;;  %v1207_v21 = vld [vmem:[%s1526_s1 + $0xd0] sm:$0xff]  }
   0x7   :  { %v1200_v14 = vld [vmem:[%s1526_s1 + $0x20] sm:$0xff]   ;;  %v1204_v18 = vld [vmem:[%s1526_s1 + $0x18] sm:$0xff]   ;;  %v1208_v22 = vld [vmem:[%s1526_s1 + $0x10] sm:$0xff]  }
   0x8   :  { %1061 = vmatpush3.bf16.msra.mxu0 %v1192_v6  ;;  %v1201_v15 = vld [vmem:[%s1526_s1 + $0xa0] sm:$0xff]   ;;  %v1205_v19 = vld [vmem:[%s1526_s1 + $0x98] sm:$0xff]   ;;  %v1209_v23 = vld [vmem:[%s1526_s1 + $0x90] sm:$0xff]  }
   0x9   :  { %1125 = vmatpush3.bf16.msra.mxu1 %v1193_v7  ;;  %1062 = vmatprep.subr.bf16.mxu0 %v1194_v8  ;;  %v1210_v24 = vld [vmem:[%s1526_s1 + $0x48] sm:$0xff]   ;;  %v1214_v28 = vld [vmem:[%s1526_s1 + $0x40] sm:$0xff]  }
   0xa   :  { %1126 = vmatprep.subr.bf16.mxu1 %v1195_v9  ;;  %v1211_v25 = vld [vmem:[%s1526_s1 + $0xc8] sm:$0xff]   ;;  %v1215_v29 = vld [vmem:[%s1526_s1 + $0xc0] sm:$0xff]  }
   0xb   :  { %v1212_v26 = vld [vmem:[%s1526_s1 + $0x8] sm:$0xff]   ;;  %v1216_v30 = vld [vmem:[%s1526_s1] sm:$0xff]  }
   0xc   :  { %1063 = vmatpush3.bf16.msra.mxu0 %v1196_v10  ;;  %v1213_v27 = vld [vmem:[%s1526_s1 + $0x88] sm:$0xff]   ;;  %v1217_v31 = vld [vmem:[%s1526_s1 + $0x80] sm:$0xff]  }
   0xd   :  { %1127 = vmatpush3.bf16.msra.mxu1 %v1197_v11  ;;  %1064 = vmatprep.subr.bf16.mxu0 %v1198_v12  ;;  %v1218_v32 = vld [vmem:[%s1527_s0] ss:$16 sps:$4 sm:$0xff]   ;;  %v1220_v33 = vld [vmem:[%s1527_s0 + $0x4] ss:$16 sps:$4 sm:$0xff]   ;;  %v1221_v34 = vld [vmem:[%s1527_s0 + $0x8] ss:$16 sps:$4 sm:$0xff]  }
   0xe   :  { %1128 = vmatprep.subr.bf16.mxu1 %v1199_v13  ;;  %v1223_v35 = vld [vmem:[%s1527_s0 + $0xc] ss:$16 sps:$4 sm:$0xff]   ;;  %563 = vmatprep.mubr.bf16.mxu0 %v1220_v33  ;;  %v1224_v36 = vld [vmem:[%s1527_s0 + $0x24] ss:$16 sps:$4 sm:$0xff]   ;;  %v1228_v38 = vld [vmem:[%s1527_s0 + $0x20] ss:$16 sps:$4 sm:$0xff]  }
   0xf   :  { %660 = vmatprep.mubr.bf16.mxu1 %v1223_v35  ;;  %v1226_v37 = vld [vmem:[%s1527_s0 + $0x2c] ss:$16 sps:$4 sm:$0xff]   ;;  %v1229_v39 = vld [vmem:[%s1527_s0 + $0x28] ss:$16 sps:$4 sm:$0xff]   ;;  %v1230_v40 = vld [vmem:[%s1527_s0 + $0x44] ss:$16 sps:$4 sm:$0xff]  }
  0x10   :  { %1065 = vmatpush3.bf16.msra.mxu0 %v1200_v14  ;;  %v1232_v41 = vld [vmem:[%s1527_s0 + $0x4c] ss:$16 sps:$4 sm:$0xff]   ;;  %v1234_v42 = vld [vmem:[%s1527_s0 + $0x40] ss:$16 sps:$4 sm:$0xff]   ;;  %v1235_v43 = vld [vmem:[%s1527_s0 + $0x48] ss:$16 sps:$4 sm:$0xff]  }
  0x11   :  { %1129 = vmatpush3.bf16.msra.mxu1 %v1201_v15  ;;  %1066 = vmatprep.subr.bf16.mxu0 %v1202_v16  ;;  %v1236_v44 = vld [vmem:[%s1527_s0 + $0x64] ss:$16 sps:$4 sm:$0xff]   ;;  %v1238_v45 = vld [vmem:[%s1527_s0 + $0x6c] ss:$16 sps:$4 sm:$0xff]   ;;  %v1240_v46 = vld [vmem:[%s1527_s0 + $0x60] ss:$16 sps:$4 sm:$0xff]  }
  0x12   :  { %1130 = vmatprep.subr.bf16.mxu1 %v1203_v17  ;;  %v1241_v47 = vld [vmem:[%s1527_s0 + $0x68] ss:$16 sps:$4 sm:$0xff]   ;;  %v1242_v48 = vld [vmem:[%s1527_s0 + $0x84] ss:$16 sps:$4 sm:$0xff]   ;;  %v1244_v49 = vld [vmem:[%s1527_s0 + $0x8c] ss:$16 sps:$4 sm:$0xff]  }
  0x13   :  { %v1246_v50 = vld [vmem:[%s1527_s0 + $0x80] ss:$16 sps:$4 sm:$0xff]   ;;  %v1247_v51 = vld [vmem:[%s1527_s0 + $0x88] ss:$16 sps:$4 sm:$0xff]   ;;  %v1248_v52 = vld [vmem:[%s1527_s0 + $0xa4] ss:$16 sps:$4 sm:$0xff]  }
  0x14   :  { %1067 = vmatpush3.bf16.msra.mxu0 %v1204_v18  ;;  %v1250_v53 = vld [vmem:[%s1527_s0 + $0xac] ss:$16 sps:$4 sm:$0xff]   ;;  %v1252_v54 = vld [vmem:[%s1527_s0 + $0xa0] ss:$16 sps:$4 sm:$0xff]   ;;  %v1253_v55 = vld [vmem:[%s1527_s0 + $0xa8] ss:$16 sps:$4 sm:$0xff]  }
  0x15   :  { %1131 = vmatpush3.bf16.msra.mxu1 %v1205_v19  ;;  %1068 = vmatprep.subr.bf16.mxu0 %v1206_v20  ;;  %v1254_v56 = vld [vmem:[%s1527_s0 + $0xc4] ss:$16 sps:$4 sm:$0xff]   ;;  %v1256_v57 = vld [vmem:[%s1527_s0 + $0xcc] ss:$16 sps:$4 sm:$0xff]   ;;  %v1258_v58 = vld [vmem:[%s1527_s0 + $0xc0] ss:$16 sps:$4 sm:$0xff]  }
  0x16   :  { %1132 = vmatprep.subr.bf16.mxu1 %v1207_v21  ;;  %v1259_v59 = vld [vmem:[%s1527_s0 + $0xc8] ss:$16 sps:$4 sm:$0xff]   ;;  %v1260_v60 = vld [vmem:[%s1527_s0 + $0xe4] ss:$16 sps:$4 sm:$0xff]   ;;  %v1262_v61 = vld [vmem:[%s1527_s0 + $0xec] ss:$16 sps:$4 sm:$0xff]  }
  0x17   :  { %v1264_v62 = vld [vmem:[%s1527_s0 + $0xe0] ss:$16 sps:$4 sm:$0xff]   ;;  %v1265_v63 = vld [vmem:[%s1527_s0 + $0xe8] ss:$16 sps:$4 sm:$0xff]  }
  0x18   :  { %1069 = vmatpush3.bf16.msra.mxu0 %v1208_v22  ;;  %v973_v4 = vld [vmem:[%s1528_s2] sm:$0xff]   ;;  %v1044_v22 = vld [vmem:[%s1528_s2 + $0x8] sm:$0xff]  }
  0x19   :  { %1133 = vmatpush3.bf16.msra.mxu1 %v1209_v23  ;;  %1070 = vmatprep.subr.bf16.mxu0 %v1210_v24  ;;  %v974_v9 = vunpack.c.l.bf16 %v973_v4  ;;  %v975_v14 = vunpack.c.h.bf16 %v973_v4 }
  0x1a   :  { %1134 = vmatprep.subr.bf16.mxu1 %v1211_v25 }
  0x1c   :  { %1071 = vmatpush3.bf16.msra.mxu0 %v1212_v26 }
  0x1d   :  { %1135 = vmatpush3.bf16.msra.mxu1 %v1213_v27  ;;  %1072 = vmatprep.subr.bf16.mxu0 %v1214_v28 }
  0x1e   :  { %1136 = vmatprep.subr.bf16.mxu1 %v1215_v29 }
  0x20   :  { %1073 = vmatpush3.bf16.msra.mxu0 %v1216_v30  ;;  %v978_v30 = vunpack.c.l.bf16 %v1044_v22 }
  0x21   :  { %1137 = vmatpush3.bf16.msra.mxu1 %v1217_v31 }
  0x23   :  { %564 = vmatmul.mubr.bf16.vlgmr.msra.gmra.mxu0 %v1218_v32 }
  0x24   :  { %661 = vmatmul.mubr.bf16.vlgmr.msra.gmra.mxu1 %v1221_v34  ;;  %571 = vmatprep.mubr.bf16.mxu0 %v1224_v36  ;;  %v979_v36 = vunpack.c.h.bf16 %v1044_v22 }
  0x25   :  { %668 = vmatprep.mubr.bf16.mxu1 %v1226_v37 }
  0x2b   :  { %572 = vmatmul.mubr.bf16.gmra.mxu0 %v1228_v38 }
  0x2c   :  { %669 = vmatmul.mubr.bf16.gmra.mxu1 %v1229_v39  ;;  %579 = vmatprep.mubr.bf16.mxu0 %v1230_v40 }
  0x2d   :  { %676 = vmatprep.mubr.bf16.mxu1 %v1232_v41 }
  0x33   :  { %580 = vmatmul.mubr.bf16.gmra.mxu0 %v1234_v42 }
  0x34   :  { %677 = vmatmul.mubr.bf16.gmra.mxu1 %v1235_v43  ;;  %587 = vmatprep.mubr.bf16.mxu0 %v1236_v44  ;;  %v1045_v44 = vld [vmem:[%s1528_s2 + $0x10] sm:$0xff]  }
  0x35   :  { %684 = vmatprep.mubr.bf16.mxu1 %v1238_v45 }
  0x3b   :  { %588 = vmatmul.mubr.bf16.gmra.mxu0 %v1240_v46 }
  0x3c   :  { %685 = vmatmul.mubr.bf16.gmra.mxu1 %v1241_v47  ;;  %595 = vmatprep.mubr.bf16.mxu0 %v1242_v48 }
  0x3d   :  { %692 = vmatprep.mubr.bf16.mxu1 %v1244_v49 }
  0x43   :  { %596 = vmatmul.mubr.bf16.gmra.mxu0 %v1246_v50 }
  0x44   :  { %693 = vmatmul.mubr.bf16.gmra.mxu1 %v1247_v51  ;;  %603 = vmatprep.mubr.bf16.mxu0 %v1248_v52  ;;  %v982_v52 = vunpack.c.l.bf16 %v1045_v44 }
  0x45   :  { %700 = vmatprep.mubr.bf16.mxu1 %v1250_v53 }
  0x4b   :  { %604 = vmatmul.mubr.bf16.gmra.mxu0 %v1252_v54 }
  0x4c   :  { %701 = vmatmul.mubr.bf16.gmra.mxu1 %v1253_v55  ;;  %611 = vmatprep.mubr.bf16.mxu0 %v1254_v56 }
  0x4d   :  { %708 = vmatprep.mubr.bf16.mxu1 %v1256_v57 }
  0x53   :  { %612 = vmatmul.mubr.bf16.gmra.mxu0 %v1258_v58  ;;  %v983_v58 = vunpack.c.h.bf16 %v1045_v44 }
  0x54   :  { %709 = vmatmul.mubr.bf16.gmra.mxu1 %v1259_v59  ;;  %619 = vmatprep.mubr.bf16.mxu0 %v1260_v60 }
  0x55   :  { %716 = vmatprep.mubr.bf16.mxu1 %v1262_v61 }
  0x5b   :  { %620 = vmatmul.mubr.bf16.gmra.mxu0 %v1264_v62 }
  0x5c   :  { %717 = vmatmul.mubr.bf16.gmra.mxu1 %v1265_v63 }
  0xe3   :  { %v1074_v0 = vpop.f32.mrf.mxu0 }
  0xe4   :  { %v1138_v1 = vpop.f32.mrf.mxu1 }
  0xe5   :  { %v1075_v2 = vpop.f32.mrf.mxu0 }
  0xe6   :  { %v1076_v3 = vadd.f32 %v1075_v2, %v1074_v0  ;;  %v1139_v5 = vpop.f32.mrf.mxu1  ;;  %v1046_v2 = vld [vmem:[%s1528_s2 + $0x18] sm:$0xff]  }
  0xe7   :  { %v1140_v6 = vadd.f32 %v1139_v5, %v1138_v1  ;;  %v1077_v7 = vpop.f32.mrf.mxu0 }
  0xe8   :  { %v1141_v8 = vpop.f32.mrf.mxu1 }
  0xe9   :  { %v663_v10 = vadd.f32 %v1140_v6, %v1076_v3  ;;  %v1078_v11 = vpop.f32.mrf.mxu0 }
  0xea   :  { %v1079_v12 = vadd.f32 %v1078_v11, %v1077_v7  ;;  %v1142_v13 = vpop.f32.mrf.mxu1 }
  0xeb   :  { %v1143_v15 = vadd.f32 %v1142_v13, %v1141_v8  ;;  %v1080_v16 = vpop.f32.mrf.mxu0  ;;  %v725_v18 = vadd.f32 %v974_v9, %v663_v10  ;;  %v986_v10 = vunpack.c.l.bf16 %v1046_v2 }
  0xec   :  { %v1144_v17 = vpop.f32.mrf.mxu1 }
  0xed   :  { %v666_v19 = vadd.f32 %v1143_v15, %v1079_v12  ;;  %v1081_v20 = vpop.f32.mrf.mxu0  ;;  %v776_v28 = vmax.f32 %v725_v18, 0.0 }
  0xee   :  { %v1082_v21 = vadd.f32 %v1081_v20, %v1080_v16  ;;  %v1145_v23 = vpop.f32.mrf.mxu1  ;;  %v987_v16 = vunpack.c.h.bf16 %v1046_v2 }
  0xef   :  { %v726_v24 = vadd.f32 %v975_v14, %v666_v19  ;;  %v1146_v25 = vadd.f32 %v1145_v23, %v1144_v17  ;;  %v1083_v26 = vpop.f32.mrf.mxu0 }
  0xf0   :  { %v1147_v27 = vpop.f32.mrf.mxu1 }
  0xf1   :  { %v777_v29 = vmax.f32 %v726_v24, 0.0  ;;  %v671_v31 = vadd.f32 %v1146_v25, %v1082_v21  ;;  %v1084_v32 = vpop.f32.mrf.mxu0  ;;  %v1047_v24 = vld [vmem:[%s1528_s2 + $0x20] sm:$0xff]  }
  0xf2   :  { %v1085_v33 = vadd.f32 %v1084_v32, %v1083_v26  ;;  %v1148_v34 = vpop.f32.mrf.mxu1  ;;  %v990_v32 = vunpack.c.l.bf16 %v1047_v24 }
  0xf3   :  { %v1007_v35 = vpack.c.bf16 %v777_v29, %v776_v28  ;;  %v1149_v37 = vadd.f32 %v1148_v34, %v1147_v27  ;;  %v1086_v38 = vpop.f32.mrf.mxu0  ;;  %v727_v40 = vadd.f32 %v978_v30, %v671_v31 }
  0xf4   :  { %v1150_v39 = vpop.f32.mrf.mxu1 }
  0xf5   :  { %1008 = vst [vmem:[%s1529_s3] sm:$0xff] %v1007_v35   ;;  %v674_v41 = vadd.f32 %v1149_v37, %v1085_v33  ;;  %v1087_v42 = vpop.f32.mrf.mxu0  ;;  %v778_v50 = vmax.f32 %v727_v40, 0.0 }
  0xf6   :  { %v1088_v43 = vadd.f32 %v1087_v42, %v1086_v38  ;;  %v1151_v45 = vpop.f32.mrf.mxu1  ;;  %v991_v38 = vunpack.c.h.bf16 %v1047_v24 }
  0xf7   :  { %v728_v46 = vadd.f32 %v979_v36, %v674_v41  ;;  %v1152_v47 = vadd.f32 %v1151_v45, %v1150_v39  ;;  %v1089_v48 = vpop.f32.mrf.mxu0 }
  0xf8   :  { %v1153_v49 = vpop.f32.mrf.mxu1 }
  0xf9   :  { %v779_v51 = vmax.f32 %v728_v46, 0.0  ;;  %v679_v53 = vadd.f32 %v1152_v47, %v1088_v43  ;;  %v1090_v54 = vpop.f32.mrf.mxu0  ;;  %v1048_v46 = vld [vmem:[%s1528_s2 + $0x28] sm:$0xff]  }
  0xfa   :  { %v1091_v55 = vadd.f32 %v1090_v54, %v1089_v48  ;;  %v1154_v56 = vpop.f32.mrf.mxu1  ;;  %v994_v54 = vunpack.c.l.bf16 %v1048_v46 }
  0xfb   :  { %v1012_v57 = vpack.c.bf16 %v779_v51, %v778_v50  ;;  %v1155_v59 = vadd.f32 %v1154_v56, %v1153_v49  ;;  %v1092_v60 = vpop.f32.mrf.mxu0  ;;  %v729_v62 = vadd.f32 %v982_v52, %v679_v53 }
  0xfc   :  { %v1156_v61 = vpop.f32.mrf.mxu1 }
  0xfd   :  { %1051 = vst [vmem:[%s1529_s3 + $0x8] sm:$0xff] %v1012_v57   ;;  %v682_v63 = vadd.f32 %v1155_v59, %v1091_v55  ;;  %v1093_v0 = vpop.f32.mrf.mxu0  ;;  %v780_v8 = vmax.f32 %v729_v62, 0.0 }
  0xfe   :  { %v1094_v1 = vadd.f32 %v1093_v0, %v1092_v60  ;;  %v1157_v3 = vpop.f32.mrf.mxu1  ;;  %v995_v60 = vunpack.c.h.bf16 %v1048_v46 }
  0xff   :  { %v730_v4 = vadd.f32 %v983_v58, %v682_v63  ;;  %v1158_v5 = vadd.f32 %v1157_v3, %v1156_v61  ;;  %v1095_v6 = vpop.f32.mrf.mxu0 }
 0x100   :  { %v1159_v7 = vpop.f32.mrf.mxu1 }
 0x101   :  { %v781_v9 = vmax.f32 %v730_v4, 0.0  ;;  %v687_v11 = vadd.f32 %v1158_v5, %v1094_v1  ;;  %v1096_v12 = vpop.f32.mrf.mxu0  ;;  %v1049_v4 = vld [vmem:[%s1528_s2 + $0x30] sm:$0xff]  }
 0x102   :  { %v1097_v13 = vadd.f32 %v1096_v12, %v1095_v6  ;;  %v1160_v14 = vpop.f32.mrf.mxu1  ;;  %v998_v12 = vunpack.c.l.bf16 %v1049_v4 }
 0x103   :  { %v1017_v15 = vpack.c.bf16 %v781_v9, %v780_v8  ;;  %v1161_v17 = vadd.f32 %v1160_v14, %v1159_v7  ;;  %v1098_v18 = vpop.f32.mrf.mxu0  ;;  %v731_v20 = vadd.f32 %v986_v10, %v687_v11 }
 0x104   :  { %v1162_v19 = vpop.f32.mrf.mxu1 }
 0x105   :  { %1052 = vst [vmem:[%s1529_s3 + $0x10] sm:$0xff] %v1017_v15   ;;  %v690_v21 = vadd.f32 %v1161_v17, %v1097_v13  ;;  %v1099_v22 = vpop.f32.mrf.mxu0  ;;  %v782_v30 = vmax.f32 %v731_v20, 0.0 }
 0x106   :  { %v1100_v23 = vadd.f32 %v1099_v22, %v1098_v18  ;;  %v1163_v25 = vpop.f32.mrf.mxu1  ;;  %v999_v18 = vunpack.c.h.bf16 %v1049_v4 }
 0x107   :  { %v732_v26 = vadd.f32 %v987_v16, %v690_v21  ;;  %v1164_v27 = vadd.f32 %v1163_v25, %v1162_v19  ;;  %v1101_v28 = vpop.f32.mrf.mxu0 }
 0x108   :  { %v1165_v29 = vpop.f32.mrf.mxu1 }
 0x109   :  { %v783_v31 = vmax.f32 %v732_v26, 0.0  ;;  %v695_v33 = vadd.f32 %v1164_v27, %v1100_v23  ;;  %v1102_v34 = vpop.f32.mrf.mxu0  ;;  %v1050_v26 = vld [vmem:[%s1528_s2 + $0x38] sm:$0xff]  }
 0x10a   :  { %v1103_v35 = vadd.f32 %v1102_v34, %v1101_v28  ;;  %v1166_v36 = vpop.f32.mrf.mxu1  ;;  %v1002_v34 = vunpack.c.l.bf16 %v1050_v26 }
 0x10b   :  { %v1022_v37 = vpack.c.bf16 %v783_v31, %v782_v30  ;;  %v1167_v39 = vadd.f32 %v1166_v36, %v1165_v29  ;;  %v1104_v40 = vpop.f32.mrf.mxu0  ;;  %v733_v42 = vadd.f32 %v990_v32, %v695_v33 }
 0x10c   :  { %v1168_v41 = vpop.f32.mrf.mxu1 }
 0x10d   :  { %1053 = vst [vmem:[%s1529_s3 + $0x18] sm:$0xff] %v1022_v37   ;;  %v698_v43 = vadd.f32 %v1167_v39, %v1103_v35  ;;  %v1105_v44 = vpop.f32.mrf.mxu0  ;;  %v784_v52 = vmax.f32 %v733_v42, 0.0 }
 0x10e   :  { %v1106_v45 = vadd.f32 %v1105_v44, %v1104_v40  ;;  %v1169_v47 = vpop.f32.mrf.mxu1  ;;  %v1003_v40 = vunpack.c.h.bf16 %v1050_v26 }
 0x10f   :  { %v734_v48 = vadd.f32 %v991_v38, %v698_v43  ;;  %v1170_v49 = vadd.f32 %v1169_v47, %v1168_v41  ;;  %v1107_v50 = vpop.f32.mrf.mxu0 }
 0x110   :  { %v1171_v51 = vpop.f32.mrf.mxu1 }
 0x111   :  { %v785_v53 = vmax.f32 %v734_v48, 0.0  ;;  %v703_v55 = vadd.f32 %v1170_v49, %v1106_v45  ;;  %v1108_v56 = vpop.f32.mrf.mxu0 }
 0x112   :  { %v1109_v57 = vadd.f32 %v1108_v56, %v1107_v50  ;;  %v1172_v58 = vpop.f32.mrf.mxu1 }
 0x113   :  { %v1027_v59 = vpack.c.bf16 %v785_v53, %v784_v52  ;;  %v1173_v61 = vadd.f32 %v1172_v58, %v1171_v51  ;;  %v1110_v62 = vpop.f32.mrf.mxu0  ;;  %v735_v0 = vadd.f32 %v994_v54, %v703_v55 }
 0x114   :  { %v1174_v63 = vpop.f32.mrf.mxu1 }
 0x115   :  { %1054 = vst [vmem:[%s1529_s3 + $0x20] sm:$0xff] %v1027_v59   ;;  %v706_v1 = vadd.f32 %v1173_v61, %v1109_v57  ;;  %v1111_v2 = vpop.f32.mrf.mxu0  ;;  %v786_v10 = vmax.f32 %v735_v0, 0.0 }
 0x116   :  { %v1112_v3 = vadd.f32 %v1111_v2, %v1110_v62  ;;  %v1175_v5 = vpop.f32.mrf.mxu1 }
 0x117   :  { %v736_v6 = vadd.f32 %v995_v60, %v706_v1  ;;  %v1176_v7 = vadd.f32 %v1175_v5, %v1174_v63  ;;  %v1113_v8 = vpop.f32.mrf.mxu0 }
 0x118   :  { %v1177_v9 = vpop.f32.mrf.mxu1 }
 0x119   :  { %v787_v11 = vmax.f32 %v736_v6, 0.0  ;;  %v711_v13 = vadd.f32 %v1176_v7, %v1112_v3  ;;  %v1114_v14 = vpop.f32.mrf.mxu0 }
 0x11a   :  { %v1115_v15 = vadd.f32 %v1114_v14, %v1113_v8  ;;  %v1178_v16 = vpop.f32.mrf.mxu1 }
 0x11b   :  { %v1032_v17 = vpack.c.bf16 %v787_v11, %v786_v10  ;;  %v1179_v19 = vadd.f32 %v1178_v16, %v1177_v9  ;;  %v1116_v20 = vpop.f32.mrf.mxu0  ;;  %v737_v22 = vadd.f32 %v998_v12, %v711_v13 }
 0x11c   :  { %v1180_v21 = vpop.f32.mrf.mxu1 }
 0x11d   :  { %1055 = vst [vmem:[%s1529_s3 + $0x28] sm:$0xff] %v1032_v17   ;;  %v714_v23 = vadd.f32 %v1179_v19, %v1115_v15  ;;  %v1117_v24 = vpop.f32.mrf.mxu0  ;;  %v788_v32 = vmax.f32 %v737_v22, 0.0 }
 0x11e   :  { %v1118_v25 = vadd.f32 %v1117_v24, %v1116_v20  ;;  %v1181_v27 = vpop.f32.mrf.mxu1 }
 0x11f   :  { %v738_v28 = vadd.f32 %v999_v18, %v714_v23  ;;  %v1182_v29 = vadd.f32 %v1181_v27, %v1180_v21  ;;  %v1119_v30 = vpop.f32.mrf.mxu0 }
 0x120   :  { %v1183_v31 = vpop.f32.mrf.mxu1 }
 0x121   :  { %v789_v33 = vmax.f32 %v738_v28, 0.0  ;;  %v719_v35 = vadd.f32 %v1182_v29, %v1118_v25  ;;  %v1120_v36 = vpop.f32.mrf.mxu0 }
 0x122   :  { %v1121_v37 = vadd.f32 %v1120_v36, %v1119_v30  ;;  %v1184_v38 = vpop.f32.mrf.mxu1 }
 0x123   :  { %v1037_v39 = vpack.c.bf16 %v789_v33, %v788_v32  ;;  %v1185_v41 = vadd.f32 %v1184_v38, %v1183_v31  ;;  %v739_v42 = vadd.f32 %v1002_v34, %v719_v35 }
 0x125   :  { %1056 = vst [vmem:[%s1529_s3 + $0x30] sm:$0xff] %v1037_v39   ;;  %v722_v43 = vadd.f32 %v1185_v41, %v1121_v37  ;;  %v790_v45 = vmax.f32 %v739_v42, 0.0 }
 0x127   :  { %v740_v44 = vadd.f32 %v1003_v40, %v722_v43 }
 0x129   :  { %v791_v46 = vmax.f32 %v740_v44, 0.0 }
 0x12b   :  { %v1042_v47 = vpack.c.bf16 %v791_v46, %v790_v45 }
 0x12d   :  { %1057 = vst [vmem:[%s1529_s3 + $0x38] sm:$0xff] %v1042_v47  }

</bundles_post_ra>
